<compile_context>
chip_gen: v7x
topology: tpu7x:2x2x1
jax: 0.10.0
libtpu: 0.0.40
codegen_flags: <defaults>
</compile_context>

<pallas_src>
import functools

import jax
import jax.numpy as jnp
from jax import lax
from jax.experimental import pallas as pl
from jax.experimental.pallas import tpu as pltpu


def _round_up(x, m):
    return ((x + m - 1) // m) * m


def _vmem_limit_bytes(default=48 * 1024 * 1024):
    """~3/4 of physical VMEM (≈96 MiB v5e/v6e, ≈48 MiB v7x), safe fallback."""
    try:
        cap = getattr(pltpu.get_tpu_info(), "vmem_capacity_bytes", None)
        if not cap:
            return default
        return int(min((cap * 3) // 4, 100 * 1024 * 1024))
    except Exception:
        return default


# ----------------------------- fused body kernel ---------------------------

def _fused_body_kernel(x_ref, wf_ref, bf_ref, wr_ref, br_ref,
                       wqkv_ref, bqkv_ref, wd_ref, bd_ref, o_ref, zz_ref,
                       *, n_frames, r_chan, l_pix, cq_pad):
    """Per-study pipeline: features -> reduction -> SelfAttention -> dim-red.

    x_ref: (3, F*L) one study's frames, channels on sublanes, pixels on lanes.
    zz_ref: (C, L) bf16 VMEM scratch for the frame->channel fold.
    o_ref: (D, L) bf16 output of dimension_reduction_conv + ReLU.
    """
    # `features` backbone (1x1 conv + ReLU), all F frames batched on the lane
    # axis -> one MXU push instead of F tiny K=3 matmuls.
    x_bf = x_ref[...].astype(jnp.bfloat16)                            # (3, F*L)
    y = jnp.dot(wf_ref[...], x_bf,
                preferred_element_type=jnp.float32) + bf_ref[...]
    y = jnp.maximum(y, 0.0)                                           # (Cf, F*L)

    # frame_feature_reduction, also batched over frames.
    z = jnp.dot(wr_ref[...], y.astype(jnp.bfloat16),
                preferred_element_type=jnp.float32) + br_ref[...]     # (R, F*L)
    z_bf = z.astype(jnp.bfloat16)

    # split_dicom_frames: frames fold into channels, frame-major ordering.
    # Write straight into bf16 VMEM scratch (no concat, bounded live ranges).
    for f in range(n_frames):
        zz_ref[f * r_chan:(f + 1) * r_chan, :] = \
            z_bf[:, f * l_pix:(f + 1) * l_pix]

    zz = zz_ref[...]                                                  # (C, L)

    # SelfAttention: Q/K/V as ONE stacked matmul, then static row slices.
    qkv = jnp.dot(wqkv_ref[...], zz,
                  preferred_element_type=jnp.float32) + bqkv_ref[...]
    fq = qkv[:cq_pad].astype(jnp.bfloat16)                            # (Cqp, L)
    gk = qkv[cq_pad:2 * cq_pad].astype(jnp.bfloat16)                  # (Cqp, L)
    hv = qkv[2 * cq_pad:].astype(jnp.bfloat16)                        # (C,   L)

    # Scores transposed: s_t[j, i] = sum_c g[c, j] * f[c, i].  The torch
    # softmax(dim=1) reduces over i, i.e. the LAST axis of s_t -> XLU slot.
    s_t = lax.dot_general(gk, fq, (((0,), (0,)), ((), ())),
                          preferred_element_type=jnp.float32)         # (L, L)
    s_t = s_t - jnp.max(s_t, axis=-1, keepdims=True)
    e = jnp.exp(s_t)
    beta_t = e * pl.reciprocal(jnp.sum(e, axis=-1, keepdims=True), approx=True)
    # o[c, j] = sum_i h[c, i] * beta_t[j, i]  (no explicit transpose needed).
    o = lax.dot_general(hv, beta_t.astype(jnp.bfloat16),
                        (((1,), (1,)), ((), ())),
                        preferred_element_type=jnp.float32)           # (C, L)

    # dimension_reduction_conv + ReLU.
    d = jnp.dot(wd_ref[...], o.astype(jnp.bfloat16),
                preferred_element_type=jnp.float32) + bd_ref[...]     # (D, L)
    o_ref[...] = jnp.maximum(d, 0.0).astype(o_ref.dtype)


def fused_body(x, p, cfg):
    """features -> reduction -> split frames -> attention -> dim-red conv.

    x: NCHW (B*F, 3, H, W).  Returns (B, D, L) bf16, L = H*W.
    """
    B, F, H, W = cfg["B"], cfg["F"], cfg["H"], cfg["W"]
    Cf, R, D = cfg["Cf"], cfg["R"], cfg["D"]
    L = H * W
    C = R * F
    Cq = C // 8
    Cqp = max(8, _round_up(Cq, 8))           # sublane-aligned query/key rows

    # (B*F, 3, H, W) -> (B, 3, F*L): one cheap XLA transpose in the wrapper,
    # no transposes inside the kernel.
    x3 = x.reshape(B, F, 3, L).transpose(0, 2, 1, 3).reshape(B, 3, F * L)

    bf16 = jnp.bfloat16
    wf = p["wf"].astype(bf16)
    wr = p["wr"].astype(bf16)
    wd = p["wd"].astype(bf16)

    # Stack (zero-padded) Q/K/V weights and biases -> one MXU weight push.
    pad_q = Cqp - Cq
    wq = jnp.pad(p["wq"], ((0, pad_q), (0, 0)))
    wk = jnp.pad(p["wk"], ((0, pad_q), (0, 0)))
    bq = jnp.pad(p["bq"], ((0, pad_q), (0, 0)))
    bk = jnp.pad(p["bk"], ((0, pad_q), (0, 0)))
    wqkv = jnp.concatenate([wq, wk, p["wv"]], axis=0).astype(bf16)  # (rows, C)
    bqkv = jnp.concatenate([bq, bk, p["bv"]], axis=0)               # (rows, 1)
    rows = 2 * Cqp + C

    bfb = p["bf"].reshape(Cf, 1)
    brb = p["br"].reshape(R, 1)
    bdb = p["bd"].reshape(D, 1)

    def const_spec(shape):
        return pl.BlockSpec(shape, lambda b: (0, 0))

    return pl.pallas_call(
        functools.partial(_fused_body_kernel, n_frames=F, r_chan=R,
                          l_pix=L, cq_pad=Cqp),
        out_shape=jax.ShapeDtypeStruct((B, D, L), jnp.bfloat16),
        grid_spec=pltpu.PrefetchScalarGridSpec(
            num_scalar_prefetch=0,
            grid=(B,),
            in_specs=[
                pl.BlockSpec((pl.Squeezed(), 3, F * L), lambda b: (b, 0, 0)),
                const_spec((Cf, 3)), const_spec((Cf, 1)),
                const_spec((R, Cf)), const_spec((R, 1)),
                const_spec((rows, C)), const_spec((rows, 1)),
                const_spec((D, C)), const_spec((D, 1)),
            ],
            out_specs=pl.BlockSpec((pl.Squeezed(), D, L), lambda b: (b, 0, 0)),
            scratch_shapes=[pltpu.VMEM((C, L), jnp.bfloat16)],
        ),
        compiler_params=pltpu.CompilerParams(
            dimension_semantics=("parallel",),        # studies across TCs
            vmem_limit_bytes=_vmem_limit_bytes()),
    )(x3, wf, bfb, wr, brb, wqkv, bqkv, wd, bdb)


# ------------------------------- FC head kernel -----------------------------

def _head_kernel(x_ref, w1_ref, scale_ref, shift_ref, w2_ref, o_ref, acc_ref):
    """FC1 (reduction-tiled) -> BatchNorm1d(eval)+bias -> ReLU -> partial FC2."""
    k = pl.program_id(1)

    @pl.when(k == 0)
    def _init():
        acc_ref[...] = jnp.zeros_like(acc_ref)

    acc_ref[...] += jnp.dot(x_ref[...], w1_ref[...],
                            preferred_element_type=jnp.float32)

    @pl.when(k == pl.num_programs(1) - 1)
    def _finalize():
        # FC1 bias is folded into `shift` (= b1*scale + bn_shift) in wrapper.
        h = acc_ref[...] * scale_ref[...] + shift_ref[...]
        h = jnp.maximum(h, 0.0)                       # ReLU
        # TODO(synk): dropout is identity here (eval mode).
        o_ref[...] = jnp.dot(h.astype(jnp.bfloat16), w2_ref[...],
                             preferred_element_type=jnp.float32
                             ).astype(o_ref.dtype)


def fc_head(x, w1, b1, scale, shift, w2, b2):
    """x: (B, IN) bf16. w1: (IN, H1), w2: (H1, NO).

    grid = (H1 tiles [parallel], IN tiles [arbitrary]).  Each H1 tile streams
    its slice of w1 in big blocks (HBM-roofline friendly) and emits a partial
    FC2 contribution; the tiny partial-sum + b2 happens in the wrapper.
    """
    B, IN = x.shape
    H1 = w1.shape[1]
    NO = w2.shape[1]

    # Big reduction tiles; pad IN up to a tile multiple (zeros contribute 0).
    tk = min(2048, _round_up(IN, 128))
    in_pad = _round_up(IN, tk)
    if in_pad != IN:
        x = jnp.pad(x, ((0, 0), (0, in_pad - IN)))
        w1 = jnp.pad(w1, ((0, in_pad - IN), (0, 0)))
    tn = 512 if (H1 % 512 == 0 and H1 > 512) else H1
    nj, nk = H1 // tn, in_pad // tk

    w1b = w1.astype(jnp.bfloat16)
    w2b = w2.astype(jnp.bfloat16)
    # Fold FC1 bias into the BN shift: (acc + b1)*s + t == acc*s + (b1*s + t).
    shift_all = (b1 * scale + shift).reshape(1, H1)
    scale_r = scale.reshape(1, H1)

    partial = pl.pallas_call(
        _head_kernel,
        out_shape=jax.ShapeDtypeStruct((nj, B, NO), jnp.float32),
        grid_spec=pltpu.PrefetchScalarGridSpec(
            num_scalar_prefetch=0,
            grid=(nj, nk),
            in_specs=[
                pl.BlockSpec((B, tk), lambda j, k: (0, k)),
                pl.BlockSpec((tk, tn), lambda j, k: (k, j)),
                pl.BlockSpec((1, tn), lambda j, k: (0, j)),
                pl.BlockSpec((1, tn), lambda j, k: (0, j)),
                pl.BlockSpec((tn, NO), lambda j, k: (j, 0)),
            ],
            out_specs=pl.BlockSpec((pl.Squeezed(), B, NO),
                                   lambda j, k: (j, 0, 0)),
            scratch_shapes=[pltpu.VMEM((B, tn), jnp.float32)],
        ),
        compiler_params=pltpu.CompilerParams(
            dimension_semantics=("parallel", "arbitrary"),
            vmem_limit_bytes=_vmem_limit_bytes()),
    )(x, w1b, scale_r, shift_all, w2b)

    return jnp.sum(partial, axis=0) + b2.reshape(1, NO)


# ------------------------------ EFNet forward -------------------------------

def make_params(key, cfg):
    """Deterministic synthetic parameters (module __init__ only defines shapes).

    Conv weights in (Cout, Cin) "W @ X" orientation; FC weights in (In, Out).
    """
    ks = jax.random.split(key, 16)
    Cf, R, F, D, H1, NO = (cfg["Cf"], cfg["R"], cfg["F"], cfg["D"],
                           cfg["H1"], cfg["NO"])
    C = R * F
    Cq = C // 8
    flat = D * cfg["H"] * cfg["W"]
    n = lambda k, s, sc=0.05: sc * jax.random.normal(k, s, jnp.float32)
    return {
        # `features` backbone stand-in: 1x1 conv + ReLU
        "wf": n(ks[0], (Cf, 3)), "bf": n(ks[1], (Cf,)),
        # frame_feature_reduction
        "wr": n(ks[2], (R, Cf)), "br": n(ks[3], (R,)),
        # SelfAttention (Conv1d weights (Cout, Cin), biases as column vectors)
        "wq": n(ks[4], (Cq, C)), "bq": n(ks[5], (Cq, 1)),
        "wk": n(ks[6], (Cq, C)), "bk": n(ks[7], (Cq, 1)),
        "wv": n(ks[8], (C, C)), "bv": n(ks[9], (C, 1)),
        # dimension_reduction_conv
        "wd": n(ks[10], (D, C)), "bd": n(ks[11], (D,)),
        # FC1 + BatchNorm1d (running stats)
        "w1": n(ks[12], (flat, H1)), "b1": n(ks[13], (H1,)),
        "bn_gamma": 1.0 + 0.01 * jnp.arange(H1, dtype=jnp.float32),
        "bn_beta": 0.01 * jnp.arange(H1, dtype=jnp.float32),
        "bn_mean": 0.001 * jnp.arange(H1, dtype=jnp.float32),
        "bn_var": 1.0 + 0.001 * jnp.arange(H1, dtype=jnp.float32),
        # FC2
        "w2": n(ks[14], (H1, NO)), "b2": n(ks[15], (NO,)),
    }


def efnet_forward(x, p, cfg):
    """x: NCHW (B*F, 3, H, W) float32 -> (B, NO)."""
    B, H, W, D = cfg["B"], cfg["H"], cfg["W"], cfg["D"]

    # features -> frame_feature_reduction -> split_dicom_frames ->
    # SelfAttention -> dimension_reduction_conv(+ReLU), one kernel, bf16 out.
    body = fused_body(x, p, cfg)                 # (B, D, L)

    # flatten: (B, D, L) has the same memory order as (B, D, H, W) flattened.
    xf = body.reshape(B, D * H * W)

    # FC1 -> BN(eval) -> ReLU -> dropout(id) -> FC2 -> dropout(id)
    eps = 1e-5
    scale = p["bn_gamma"] / jnp.sqrt(p["bn_var"] + eps)
    shift = p["bn_beta"] - p["bn_mean"] * scale
    return fc_head(xf, p["w1"], p["b1"], scale, shift, p["w2"], p["b2"])


if __name__ == "__main__":
    cfg = dict(
        B=2,         # number of studies (batch after frame split)
        F=2,         # DICOM_frame_nbr
        H=16, W=16,  # spatial size of feature maps (L = 256, lane-dense)
        Cf=8,        # backbone output channels
        R=16,        # self_attention_feature_reduction (small analog of 256)
        D=16,        # dimension_reduction_conv output channels (analog of 256)
        H1=128,      # FC1 hidden size (analog of 1024)
        NO=4,        # classification output_nbr
    )
    key = jax.random.PRNGKey(0)
    kx, kp = jax.random.split(key)
    x = jax.random.normal(kx, (cfg["B"] * cfg["F"], 3, cfg["H"], cfg["W"]),
                          jnp.float32)
    params = make_params(kp, cfg)

    out = efnet_forward(x, params, cfg)
    jax.block_until_ready(out)
    assert out.shape == (cfg["B"], cfg["NO"])
    print("KERNEL_OK")
</pallas_src>

<mosaic_0001>
module attributes {stable_mosaic.version = 11 : i64} {
  func.func @_fused_body_kernel(%arg0: i32, %arg1: memref<1x3x512xf32, #tpu.memory_space<vmem>>, %arg2: memref<8x3xbf16, #tpu.memory_space<vmem>>, %arg3: memref<8x1xf32, #tpu.memory_space<vmem>>, %arg4: memref<16x8xbf16, #tpu.memory_space<vmem>>, %arg5: memref<16x1xf32, #tpu.memory_space<vmem>>, %arg6: memref<48x32xbf16, #tpu.memory_space<vmem>>, %arg7: memref<48x1xf32, #tpu.memory_space<vmem>>, %arg8: memref<16x32xbf16, #tpu.memory_space<vmem>>, %arg9: memref<16x1xf32, #tpu.memory_space<vmem>>, %arg10: memref<1x16x256xbf16, #tpu.memory_space<vmem>>, %arg11: memref<32x256xbf16, #tpu.memory_space<vmem>>) attributes {dimension_semantics = [#tpu.dimension_semantics<parallel>], iteration_bounds = array<i64: 2>, scalar_prefetch = 0 : i64, scratch_operands = 1 : i64, tpu.core_type = #tpu.core_type<tc>, window_params = [{transform_indices = @transform_0, window_bounds = array<i64: 1, 3, 512>}, {pipeline_mode = #tpu.pipeline_mode<synchronous>, transform_indices = @transform_1, window_bounds = array<i64: 8, 3>}, {pipeline_mode = #tpu.pipeline_mode<synchronous>, transform_indices = @transform_2, window_bounds = array<i64: 8, 1>}, {pipeline_mode = #tpu.pipeline_mode<synchronous>, transform_indices = @transform_3, window_bounds = array<i64: 16, 8>}, {pipeline_mode = #tpu.pipeline_mode<synchronous>, transform_indices = @transform_4, window_bounds = array<i64: 16, 1>}, {pipeline_mode = #tpu.pipeline_mode<synchronous>, transform_indices = @transform_5, window_bounds = array<i64: 48, 32>}, {pipeline_mode = #tpu.pipeline_mode<synchronous>, transform_indices = @transform_6, window_bounds = array<i64: 48, 1>}, {pipeline_mode = #tpu.pipeline_mode<synchronous>, transform_indices = @transform_7, window_bounds = array<i64: 16, 32>}, {pipeline_mode = #tpu.pipeline_mode<synchronous>, transform_indices = @transform_8, window_bounds = array<i64: 16, 1>}, {transform_indices = @transform_9, window_bounds = array<i64: 1, 16, 256>}]} {
    %c0 = arith.constant 0 : index
    %c0_0 = arith.constant 0 : index
    %c0_1 = arith.constant 0 : index
    %0 = vector.load %arg1[%c0, %c0_0, %c0_1] : memref<1x3x512xf32, #tpu.memory_space<vmem>>, vector<1x3x512xf32>
    %1 = vector.shape_cast %0 : vector<1x3x512xf32> to vector<3x512xf32>
    %2 = arith.truncf %1 : vector<3x512xf32> to vector<3x512xbf16>
    %c0_2 = arith.constant 0 : index
    %c0_3 = arith.constant 0 : index
    %3 = vector.load %arg2[%c0_2, %c0_3] : memref<8x3xbf16, #tpu.memory_space<vmem>>, vector<8x3xbf16>
    %cst = arith.constant dense<0.000000e+00> : vector<8x512xf32>
    %4 = tpu.matmul %3, %2, %cst {dimension_numbers = #tpu.dot_dimension_numbers<[1], [0], [0], [1], [0, 0, 1, 1], [], []>} : vector<8x3xbf16>, vector<3x512xbf16>, vector<8x512xf32> -> vector<8x512xf32>
    %c0_4 = arith.constant 0 : index
    %c0_5 = arith.constant 0 : index
    %5 = vector.load %arg3[%c0_4, %c0_5] : memref<8x1xf32, #tpu.memory_space<vmem>>, vector<8x1xf32>
    %6 = vector.broadcast %5 : vector<8x1xf32> to vector<8x512xf32>
    %7 = arith.addf %4, %6 : vector<8x512xf32>
    %cst_6 = arith.constant 0.000000e+00 : f32
    %8 = vector.broadcast %cst_6 : f32 to vector<8x512xf32>
    %9 = arith.maximumf %7, %8 : vector<8x512xf32>
    %c0_7 = arith.constant 0 : index
    %c0_8 = arith.constant 0 : index
    %10 = vector.load %arg4[%c0_7, %c0_8] : memref<16x8xbf16, #tpu.memory_space<vmem>>, vector<16x8xbf16>
    %11 = arith.truncf %9 : vector<8x512xf32> to vector<8x512xbf16>
    %cst_9 = arith.constant dense<0.000000e+00> : vector<16x512xf32>
    %12 = tpu.matmul %10, %11, %cst_9 {dimension_numbers = #tpu.dot_dimension_numbers<[1], [0], [0], [1], [0, 0, 1, 1], [], []>} : vector<16x8xbf16>, vector<8x512xbf16>, vector<16x512xf32> -> vector<16x512xf32>
    %c0_10 = arith.constant 0 : index
    %c0_11 = arith.constant 0 : index
    %13 = vector.load %arg5[%c0_10, %c0_11] : memref<16x1xf32, #tpu.memory_space<vmem>>, vector<16x1xf32>
    %14 = vector.broadcast %13 : vector<16x1xf32> to vector<16x512xf32>
    %15 = arith.addf %12, %14 : vector<16x512xf32>
    %16 = arith.truncf %15 : vector<16x512xf32> to vector<16x512xbf16>
    %17 = vector.extract_strided_slice %16 {offsets = [0, 0], sizes = [16, 256], strides = [1, 1]} : vector<16x512xbf16> to vector<16x256xbf16>
    %c0_12 = arith.constant 0 : index
    %c0_13 = arith.constant 0 : index
    %18 = vector.load %arg11[%c0_12, %c0_13] : memref<32x256xbf16, #tpu.memory_space<vmem>>, vector<16x256xbf16>
    tpu.vector_store %arg11[%c0_12, %c0_13], %17 {strides = array<i32>} : memref<32x256xbf16, #tpu.memory_space<vmem>>, vector<16x256xbf16>,
    %19 = vector.extract_strided_slice %16 {offsets = [0, 256], sizes = [16, 256], strides = [1, 1]} : vector<16x512xbf16> to vector<16x256xbf16>
    %c16 = arith.constant 16 : index
    %c0_14 = arith.constant 0 : index
    %20 = vector.load %arg11[%c16, %c0_14] : memref<32x256xbf16, #tpu.memory_space<vmem>>, vector<16x256xbf16>
    tpu.vector_store %arg11[%c16, %c0_14], %19 {strides = array<i32>} : memref<32x256xbf16, #tpu.memory_space<vmem>>, vector<16x256xbf16>,
    %c0_15 = arith.constant 0 : index
    %c0_16 = arith.constant 0 : index
    %21 = vector.load %arg11[%c0_15, %c0_16] : memref<32x256xbf16, #tpu.memory_space<vmem>>, vector<32x256xbf16>
    %c0_17 = arith.constant 0 : index
    %c0_18 = arith.constant 0 : index
    %22 = vector.load %arg6[%c0_17, %c0_18] : memref<48x32xbf16, #tpu.memory_space<vmem>>, vector<48x32xbf16>
    %cst_19 = arith.constant dense<0.000000e+00> : vector<48x256xf32>
    %23 = tpu.matmul %22, %21, %cst_19 {dimension_numbers = #tpu.dot_dimension_numbers<[1], [0], [0], [1], [0, 0, 1, 1], [], []>} : vector<48x32xbf16>, vector<32x256xbf16>, vector<48x256xf32> -> vector<48x256xf32>
    %c0_20 = arith.constant 0 : index
    %c0_21 = arith.constant 0 : index
    %24 = vector.load %arg7[%c0_20, %c0_21] : memref<48x1xf32, #tpu.memory_space<vmem>>, vector<48x1xf32>
    %25 = vector.broadcast %24 : vector<48x1xf32> to vector<48x256xf32>
    %26 = arith.addf %23, %25 : vector<48x256xf32>
    %27 = vector.extract_strided_slice %26 {offsets = [0, 0], sizes = [8, 256], strides = [1, 1]} : vector<48x256xf32> to vector<8x256xf32>
    %28 = arith.truncf %27 : vector<8x256xf32> to vector<8x256xbf16>
    %29 = vector.extract_strided_slice %26 {offsets = [8, 0], sizes = [8, 256], strides = [1, 1]} : vector<48x256xf32> to vector<8x256xf32>
    %30 = arith.truncf %29 : vector<8x256xf32> to vector<8x256xbf16>
    %31 = vector.extract_strided_slice %26 {offsets = [16, 0], sizes = [32, 256], strides = [1, 1]} : vector<48x256xf32> to vector<32x256xf32>
    %32 = arith.truncf %31 : vector<32x256xf32> to vector<32x256xbf16>
    %cst_22 = arith.constant dense<0.000000e+00> : vector<256x256xf32>
    %33 = tpu.matmul %30, %28, %cst_22 {dimension_numbers = #tpu.dot_dimension_numbers<[0], [0], [1], [1], [0, 1, 1, 1], [], []>} : vector<8x256xbf16>, vector<8x256xbf16>, vector<256x256xf32> -> vector<256x256xf32>
    %cst_23 = arith.constant dense<0xFF800000> : vector<256xf32>
    %34 = vector.multi_reduction <maximumf>, %33, %cst_23 [1] : vector<256x256xf32> to vector<256xf32>
    %35 = vector.shape_cast %34 : vector<256xf32> to vector<256x1xf32>
    %36 = vector.broadcast %35 : vector<256x1xf32> to vector<256x256xf32>
    %37 = arith.subf %33, %36 : vector<256x256xf32>
    %38 = math.exp %37 : vector<256x256xf32>
    %cst_24 = arith.constant dense<0.000000e+00> : vector<256xf32>
    %39 = vector.multi_reduction <add>, %38, %cst_24 [1] : vector<256x256xf32> to vector<256xf32>
    %40 = vector.shape_cast %39 : vector<256xf32> to vector<256x1xf32>
    %41 = tpu.reciprocal %40 {approx = true} : vector<256x1xf32> -> vector<256x1xf32>
    %42 = vector.broadcast %41 : vector<256x1xf32> to vector<256x256xf32>
    %43 = arith.mulf %38, %42 : vector<256x256xf32>
    %44 = arith.truncf %43 : vector<256x256xf32> to vector<256x256xbf16>
    %cst_25 = arith.constant dense<0.000000e+00> : vector<32x256xf32>
    %45 = tpu.matmul %32, %44, %cst_25 {dimension_numbers = #tpu.dot_dimension_numbers<[1], [1], [0], [0], [0, 0, 1, 0], [], []>} : vector<32x256xbf16>, vector<256x256xbf16>, vector<32x256xf32> -> vector<32x256xf32>
    %c0_26 = arith.constant 0 : index
    %c0_27 = arith.constant 0 : index
    %46 = vector.load %arg8[%c0_26, %c0_27] : memref<16x32xbf16, #tpu.memory_space<vmem>>, vector<16x32xbf16>
    %47 = arith.truncf %45 : vector<32x256xf32> to vector<32x256xbf16>
    %cst_28 = arith.constant dense<0.000000e+00> : vector<16x256xf32>
    %48 = tpu.matmul %46, %47, %cst_28 {dimension_numbers = #tpu.dot_dimension_numbers<[1], [0], [0], [1], [0, 0, 1, 1], [], []>} : vector<16x32xbf16>, vector<32x256xbf16>, vector<16x256xf32> -> vector<16x256xf32>
    %c0_29 = arith.constant 0 : index
    %c0_30 = arith.constant 0 : index
    %49 = vector.load %arg9[%c0_29, %c0_30] : memref<16x1xf32, #tpu.memory_space<vmem>>, vector<16x1xf32>
    %50 = vector.broadcast %49 : vector<16x1xf32> to vector<16x256xf32>
    %51 = arith.addf %48, %50 : vector<16x256xf32>
    %cst_31 = arith.constant 0.000000e+00 : f32
    %52 = vector.broadcast %cst_31 : f32 to vector<16x256xf32>
    %53 = arith.maximumf %51, %52 : vector<16x256xf32>
    %54 = arith.truncf %53 : vector<16x256xf32> to vector<16x256xbf16>
    %c0_32 = arith.constant 0 : index
    %c0_33 = arith.constant 0 : index
    %c0_34 = arith.constant 0 : index
    %55 = vector.load %arg10[%c0_32, %c0_33, %c0_34] : memref<1x16x256xbf16, #tpu.memory_space<vmem>>, vector<1x16x256xbf16>
    %56 = vector.shape_cast %55 : vector<1x16x256xbf16> to vector<16x256xbf16>
    %57 = vector.shape_cast %54 : vector<16x256xbf16> to vector<1x16x256xbf16>
    tpu.vector_store %arg10[%c0_32, %c0_33, %c0_34], %57 {strides = array<i32>} : memref<1x16x256xbf16, #tpu.memory_space<vmem>>, vector<1x16x256xbf16>,
    return
  }
  func.func @transform_0(%arg0: i32) -> (i32, i32, i32) {
    %c0_i32 = arith.constant 0 : i32
    %c0_i32_0 = arith.constant 0 : i32
    %c0_i32_1 = arith.constant 0 : i32
    return %arg0, %c0_i32, %c0_i32_0 : i32, i32, i32
  }
  func.func @transform_1(%arg0: i32) -> (i32, i32) {
    %c0_i32 = arith.constant 0 : i32
    %c0_i32_0 = arith.constant 0 : i32
    %c0_i32_1 = arith.constant 0 : i32
    return %c0_i32, %c0_i32_0 : i32, i32
  }
  func.func @transform_2(%arg0: i32) -> (i32, i32) {
    %c0_i32 = arith.constant 0 : i32
    %c0_i32_0 = arith.constant 0 : i32
    %c0_i32_1 = arith.constant 0 : i32
    return %c0_i32, %c0_i32_0 : i32, i32
  }
  func.func @transform_3(%arg0: i32) -> (i32, i32) {
    %c0_i32 = arith.constant 0 : i32
    %c0_i32_0 = arith.constant 0 : i32
    %c0_i32_1 = arith.constant 0 : i32
    return %c0_i32, %c0_i32_0 : i32, i32
  }
  func.func @transform_4(%arg0: i32) -> (i32, i32) {
    %c0_i32 = arith.constant 0 : i32
    %c0_i32_0 = arith.constant 0 : i32
    %c0_i32_1 = arith.constant 0 : i32
    return %c0_i32, %c0_i32_0 : i32, i32
  }
  func.func @transform_5(%arg0: i32) -> (i32, i32) {
    %c0_i32 = arith.constant 0 : i32
    %c0_i32_0 = arith.constant 0 : i32
    %c0_i32_1 = arith.constant 0 : i32
    return %c0_i32, %c0_i32_0 : i32, i32
  }
  func.func @transform_6(%arg0: i32) -> (i32, i32) {
    %c0_i32 = arith.constant 0 : i32
    %c0_i32_0 = arith.constant 0 : i32
    %c0_i32_1 = arith.constant 0 : i32
    return %c0_i32, %c0_i32_0 : i32, i32
  }
  func.func @transform_7(%arg0: i32) -> (i32, i32) {
    %c0_i32 = arith.constant 0 : i32
    %c0_i32_0 = arith.constant 0 : i32
    %c0_i32_1 = arith.constant 0 : i32
    return %c0_i32, %c0_i32_0 : i32, i32
  }
  func.func @transform_8(%arg0: i32) -> (i32, i32) {
    %c0_i32 = arith.constant 0 : i32
    %c0_i32_0 = arith.constant 0 : i32
    %c0_i32_1 = arith.constant 0 : i32
    return %c0_i32, %c0_i32_0 : i32, i32
  }
  func.func @transform_9(%arg0: i32) -> (i32, i32, i32) {
    %c0_i32 = arith.constant 0 : i32
    %c0_i32_0 = arith.constant 0 : i32
    %c0_i32_1 = arith.constant 0 : i32
    return %arg0, %c0_i32, %c0_i32_0 : i32, i32, i32
  }
}

</mosaic_0001>

<bundles_post_ra>
// kernel: tpu_custom_call.1
= control target key start
LH: loop header
LB: loop body
LE: loop exit
PB: predicated region body
PF: predicated region fallthrough
CT: control target
= control target key end

     0   :  { %14 = vsyncpa [#allocation4], 0  ;;  %s2922_s0 = inlined_call_operand.vmem [shape: f32[2,3,512], index: 0, kind: input, shape index: {}]   ;;  %s2923_s1 = inlined_call_operand.vmem [shape: bf16[8,3], index: 1, kind: input, shape index: {}]   ;;  %s2924_s2 = inlined_call_operand.vmem [shape: f32[8,1], index: 2, kind: input, shape index: {}]   ;;  %s2925_s3 = inlined_call_operand.vmem [shape: bf16[16,8], index: 3, kind: input, shape index: {}]   ;;  %s2926_s4 = inlined_call_operand.vmem [shape: f32[16,1], index: 4, kind: input, shape index: {}]   ;;  %s2927_s5 = inlined_call_operand.vmem [shape: bf16[48,32], index: 5, kind: input, shape index: {}]   ;;  %s2928_s6 = inlined_call_operand.vmem [shape: f32[48,1], index: 6, kind: input, shape index: {}]   ;;  %s2929_s7 = inlined_call_operand.vmem [shape: bf16[16,32], index: 7, kind: input, shape index: {}]   ;;  %s2930_s8 = inlined_call_operand.vmem [shape: f32[16,1], index: 8, kind: input, shape index: {}]   ;;  %s2931_s9 = inlined_call_operand.hbm [shape: bf16[2,16,256], index: 9, kind: output, shape index: {}]  }
   0x1   :  { %16 = vsyncpa [#allocation4 + $0x1], 0  ;;  %s2153_s30 = smov 0   ;;  %s2155_s10 = smov 0  }
   0x2   :  { %s2157_s11 = smov 0   ;;  %s2159_s12 = smov 0  }
   0x3 LB: > { %s2174_s13 = sadd.s32 4294967295, %s2096_s12   ;;  %s1740_s14 = sadd.s32 4294967294, %s2096_s12   ;;  %s2096_s12 = sphi %s2159_s12, %s3027_s12   ;;  %s2092_s11 = sphi %s2157_s11, %s3026_s11   ;;  %s2088_s10 = sphi %s2155_s10, %s3025_s10   ;;  %s2084_s30 = sphi %s2153_s30, %s3024_s30  }
   0x4   : > { %s2178_s15 = sadd.s32 1, %s2096_s12   ;;  %s223_s16 = sadd.s32 1, %s2092_s11 }
   0x5   : > { %s220_s17 = ssub.s32 %s2096_s12, %s2178_s15  ;;  %p233_p0 = scmp.ne.s32.totalorder %s2092_s11, %s2088_s10 }
   0x6   : > { %p221_p1 = scmp.eq.s32.totalorder %s220_s17, 0  ;;  %p234_p2 = scmp.eq.s32.totalorder %s2174_s13, 1 }
   0x7   : > { %p239_p3 = scmp.ne.s32.totalorder %s2088_s10, %s2084_s30  ;;  %p240_p4 = scmp.eq.s32.totalorder %s1740_s14, 1 }
   0x8   : > { %s2189_s18 = scalar_select %p221_p1, %s2092_s11, %s223_s16  }
   0x9   : > { %p2191_p5 = por %p234_p2, %p233_p0  ;;  %p2195_p6 = por %p240_p4, %p239_p3 }
   0xa   : > { %p1743_p7 = scmp.ge.s32.totalorder %s2096_s12, 1  ;;  %p290_p8 = scmp.lt.s32.totalorder %s2096_s12, 3 }
   0xc   : > { %p291_p9 = pnand %p1743_p7, %p290_p8 }
   0xe   : > { %294 = sbr.rel (%p291_p9) target bundleno = 2042 (0x7fa), region = 56 }
  0x15   : > { %p326_p10 = scmp.lt.s32.totalorder %s2174_s13, 1  ;;  %vm355_vm0 = vcmask 1040384   ;;  %v345_v0 = vld [vmem:[%s2924_s2] sm:$0xff]  ;;  %vm356_vm1 = vcmask 1041408   ;;  %v2932_v1 = vmov 0   ;;  %v2099_v2 = vmov 65535  }
  0x16   : > { %403 = vmatprep.mubr.bf16.mxu0 %v2932_v1  ;;  %444 = vmatprep.mubr.bf16.mxu1 %v2932_v1  ;;  %v357_v3 = vsel %vm355_vm0, 4294967295, %v2099_v2  ;;  %v463_v4 = vld [vmem:[%s2926_s4] sm:$0xff]  ;;  %vm351_vm2 = vcmask 23552   ;;  %v464_v20 = vld [vmem:[%s2926_s4 + $0x8] sm:$0xff]  ;;  %vm484_vm3 = vcmask 1043456   ;;  %vm480_vm4 = vcmask 64512  }
  0x17   : > { %s327_s23 = scalar_select %p326_p10, %s2174_s13, 1  ;;  %1833 = vset.pattern.permute.xlu0 %v2932_v1  ;;  %1834 = vset.pattern.permute.xlu1 %v2932_v1  ;;  %v358_v6 = vsel %vm356_vm1, %v357_v3, 0  ;;  %v601_v12 = vld [vmem:[%s2928_s6] sm:$0xff]  ;;  %v602_v21 = vld [vmem:[%s2928_s6 + $0x8] sm:$0xff]  ;;  %vm652_vm5 = vcmask 261120  }
  0x18   : > { %348 = vperm.xlu0 %1833, %v345_v0   ;;  %v344_v19 = vld [vmem:[%s2923_s1] sm:$0xf]  ;;  %472 = vperm.xlu1 %1834, %v464_v20   ;;  %s1789_s28 = sshll.u32 %s2174_s13, 8  ;;  %s2100_s13 = smov [#allocation3]  }
  0x19   : > { %s1786_s24 = sshll.u32 %s327_s23, 4  ;;  %v1837_v45 = vld [vmem:[%s2925_s3] sm:$0xff]   ;;  %s2879_s16 = scalar_lea.hbm %s2931_s9, %s1789_s28 }
  0x1a   : > { %s330_s29 = scalar_lea.vmem %s2922_s0, %s1786_s24  ;;  %s323_s24 = sand.u32 1, %s2088_s10  }
  0x1b   : > { %v332_v5 = vld [vmem:[%s330_s29] sm:$0x77]  ;;  %v333_v7 = vld [vmem:[%s330_s29 + $0x8] sm:$0x77]  ;;  %s1744_s25 = sshll.u32 %s323_s24, 4  ;;  %s2881_s17 = scalar_lea.sflag [#allocation4], %s323_s24 }
  0x1c   : > { %v336_v8 = vcombine.high %v332_v5, %v332_v5  ;;  %v337_v9 = vcombine.high %v333_v7, %v333_v7  ;;  %v340_v10 = vpack.c.bf16 %v332_v5, %v332_v5  ;;  %v342_v11 = vpack.c.bf16 %v333_v7, %v333_v7  ;;  %467 = vperm.xlu0 %1833, %v463_v4   ;;  %v1838_v5 = vld [vmem:[%s2927_s5] sm:$0xff]   ;;  %s325_s26 = scalar_lea.vmem [#allocation3], %s1744_s25  ;;  %s2038_s22 = sshll.u32 %s2100_s13, 4  ;;  %s2039_s22 = int_to_ptr.vmem [resolvable:$false] %s2038_s22 }
  0x1d   : > { %614 = vperm.xlu1 %1834, %v602_v21   ;;  %s1678_s27 = sshll.u32 %s325_s26, 4  ;;  %s2040_s23 = scalar_lea.vmem %s2039_s22, 512  ;;  %s2874_s27 = int_to_ptr.vmem [resolvable:$true] %s1678_s27 }
  0x1e   : > { %v341_v13 = vpack.c.bf16 %v336_v8, %v336_v8  ;;  %v343_v14 = vpack.c.bf16 %v337_v9, %v337_v9  ;;  %v360_v15 = vand.u32 %v358_v6, %v340_v10  ;;  %v366_v16 = vand.u32 %v358_v6, %v342_v11  ;;  %s2034_s21 = scalar_lea.vmem %s2874_s27, 256  ;;  %p2041_p0 = scmp.lt.s32.totalorder %s2874_s27, %s2039_s22 }
  0x1f   : > { %p2035_p11 = scmp.ne.s32.totalorder %s2874_s27, %s2034_s21  ;;  %p2042_p1 = scmp.lt.s32.totalorder %s2040_s23, %s2034_s21 }
  0x20   : > { %v363_v17 = vand.u32 %v358_v6, %v341_v13  ;;  %v369_v18 = vand.u32 %v358_v6, %v343_v14  ;;  %609 = vperm.xlu0 %1833, %v601_v12  }
  0x21   : > { %p2036_p12 = pnand %p2035_p11, %p2191_p5  ;;  %p2043_p2 = por %p2042_p1, %p2041_p0 }
  0x22   : > { %371 = vmatprep.subr.bf16.mxu0 %v363_v17  ;;  %412 = vmatprep.subr.bf16.mxu1 %v369_v18 }
  0x23   : > { %372 = vmatpush1.bf16.msra.mxu0 %v360_v15  ;;  %413 = vmatpush1.bf16.msra.mxu1 %v366_v16  ;;  %p2037_p13 = pneg %p2036_p12 }
  0x25   : > { %p2044_p3 = pnand %p2043_p2, %p2037_p13 }
  0x26   : > { %1747 = vmatmul.mubr.msk.bf16.vlgmr.msra.gmra.mrb[0].mxu0 %vm351_vm2, %v344_v19  ;;  %1748 = vmatmul.mubr.msk.bf16.vlgmr.msra.gmra.mrb[0].mxu1 %vm351_vm2, %v344_v19 }
  0x27   : > { %529 = vmatprep.mubr.bf16.mxu0 %v2932_v1  ;;  %572 = vmatprep.mubr.bf16.mxu1 %v2932_v1 }
  0x97   : > { %v349_v22 = vpop.permute.xlu0 %348  ;;  %v473_v47 = vpop.permute.xlu1 %472 }
  0x9b   : > { %v468_v46 = vpop.permute.xlu0 %467 }
  0x9c   : > { %v615_v10 = vpop.permute.xlu1 %614 }
  0x9f   : > { %v610_v6 = vpop.permute.xlu0 %609 }
  0xf9   : > { %v405_v23 = vpop.f32.mrb[0].mxu0  ;;  %v446_v24 = vpop.f32.mrb[0].mxu1 }
  0xfa   : > { %v406_v25 = vadd.f32 %v405_v23, %v349_v22  ;;  %v447_v26 = vadd.f32 %v446_v24, %v349_v22  ;;  %v407_v27 = vpop.f32.mrb[1].mxu0  ;;  %v448_v28 = vpop.f32.mrb[1].mxu1 }
  0xfb   : > { %v408_v29 = vadd.f32 %v407_v27, %v349_v22  ;;  %v449_v30 = vadd.f32 %v448_v28, %v349_v22  ;;  %v409_v31 = vpop.f32.mrb[2].mxu0  ;;  %v450_v32 = vpop.f32.mrb[2].mxu1 }
  0xfc   : > { %v453_v33 = vmax.f32 %v406_v25, 0.0  ;;  %v455_v34 = vmax.f32 %v447_v26, 0.0  ;;  %v410_v35 = vpop.f32.mrb[3].mxu0  ;;  %v451_v36 = vpop.f32.mrb[3].mxu1 }
  0xfd   : > { %v454_v37 = vmax.f32 %v408_v29, 0.0  ;;  %v456_v38 = vmax.f32 %v449_v30, 0.0 }
  0xfe   : > { %v459_v39 = vpack.c.bf16 %v453_v33, %v453_v33  ;;  %v461_v40 = vpack.c.bf16 %v455_v34, %v455_v34 }
  0xff   : > { %v460_v41 = vpack.c.bf16 %v454_v37, %v454_v37  ;;  %v462_v42 = vpack.c.bf16 %v456_v38, %v456_v38 }
 0x100   : > { %v486_v43 = vsel %vm484_vm3, %v459_v39, 0  ;;  %v492_v44 = vsel %vm484_vm3, %v461_v40, 0 }
 0x101   : > { %1750 = vmatprep.subr.msk.bf16.mxu0 %vm484_vm3, %v460_v41  ;;  %1752 = vmatprep.subr.msk.bf16.mxu1 %vm484_vm3, %v462_v42 }
 0x102   : > { %498 = vmatpush1.bf16.msra.mxu0 %v486_v43  ;;  %541 = vmatpush1.bf16.msra.mxu1 %v492_v44 }
 0x105   : > { %1751 = vmatmul.mubr.msk.bf16.vlgmr.msra.gmra.mrb[4].mxu0 %vm480_vm4, %v1837_v45  ;;  %1753 = vmatmul.mubr.msk.bf16.vlgmr.msra.gmra.mrb[4].mxu1 %vm480_vm4, %v1837_v45 }
 0x106   : > { %694 = vmatprep.mubr.bf16.mxu0 %v2932_v1  ;;  %851 = vmatprep.mubr.bf16.mxu1 %v2932_v1 }
 0x1d8   : > { %v531_v48 = vpop.f32.mrb[4].mxu0  ;;  %v574_v49 = vpop.f32.mrb[4].mxu1 }
 0x1d9   : > { %v533_v50 = vpop.f32.mrb[5].mxu0  ;;  %v576_v51 = vpop.f32.mrb[5].mxu1  ;;  %v532_v54 = vadd.f32 %v531_v48, %v468_v46  ;;  %v575_v55 = vadd.f32 %v574_v49, %v468_v46 }
 0x1da   : > { %v535_v52 = vpop.f32.mrb[6].mxu0  ;;  %v578_v53 = vpop.f32.mrb[6].mxu1  ;;  %v534_v60 = vadd.f32 %v533_v50, %v468_v46  ;;  %v577_v61 = vadd.f32 %v576_v51, %v468_v46 }
 0x1db   : > { %v536_v56 = vadd.f32 %v535_v52, %v473_v47  ;;  %v579_v57 = vadd.f32 %v578_v53, %v473_v47  ;;  %v537_v58 = vpop.f32.mrb[7].mxu0  ;;  %v580_v59 = vpop.f32.mrb[7].mxu1 }
 0x1dc   : > { %v538_v62 = vadd.f32 %v537_v58, %v473_v47  ;;  %v581_v63 = vadd.f32 %v580_v59, %v473_v47 }
 0x1dd   : > { %v583_v0 = vpack.c.bf16 %v536_v56, %v532_v54  ;;  %v585_v2 = vpack.c.bf16 %v579_v57, %v575_v55 }
 0x1de   : > { %v584_v3 = vpack.c.bf16 %v538_v62, %v534_v60  ;;  %v586_v4 = vpack.c.bf16 %v581_v63, %v577_v61 }
 0x1e0   : > { %662 = vmatprep.subr.bf16.mxu0 %v584_v3 }
 0x1e1   : > { %663 = vmatpush1.bf16.msra.mxu0 %v583_v0 }
 0x1e2   : > { %664 = vmatprep.subr.bf16.mxu0 %v586_v4 }
 0x1e5   : > { %665 = vmatpush1.bf16.msra.mxu0 %v585_v2 }
 0x1e8   : > { %1757 = vmatmul.mubr.msk.bf16.vlgmr.msra.gmra.mrb[8].mxu0 %vm652_vm5, %v1838_v5 }
 0x1e9   : > { %704 = vmatprep.mubr.bf16.mxu0 %v2932_v1 }
 0x2bb   : > { %v696_v7 = vpop.f32.mrb[8].mxu0 }
 0x2bc   : > { %v697_v8 = vadd.f32 %v696_v7, %v610_v6  ;;  %v698_v9 = vpop.f32.mrb[9].mxu0 }
 0x2bd   : > { %v699_v11 = vadd.f32 %v698_v9, %v610_v6  ;;  %v700_v12 = vpop.f32.mrb[10].mxu0 }
 0x2be   : > { %v725_v13 = vpack.c.bf16 %v697_v8, %v697_v8  ;;  %v701_v14 = vadd.f32 %v700_v12, %v615_v10  ;;  %v702_v15 = vpop.f32.mrb[11].mxu0 }
 0x2bf   : > { %v726_v16 = vpack.c.bf16 %v699_v11, %v699_v11  ;;  %v703_v17 = vadd.f32 %v702_v15, %v615_v10 }
 0x2c0   : > { %v814_v18 = vsel %vm484_vm3, %v725_v13, 0  ;;  %v727_v19 = vpack.c.bf16 %v701_v14, %v701_v14 }
 0x2c1   : > { %v728_v20 = vpack.c.bf16 %v703_v17, %v703_v17  ;;  %1760 = vmatprep.subr.msk.bf16.mxu1 %vm484_vm3, %v726_v16 }
 0x2c2   : > { %733 = vxpose.xlu1.c.b16.start.end [1/1] (short) %v727_v19, 128  ;;  %820 = vmatpush1.bf16.msra.mxu1 %v814_v18 }
 0x2c3   : > { %749 = vxpose.xlu0.c.b16.start.end [1/1] (short) %v728_v20, 128 }
 0x328   : > { %v741_v21 = vpop.trf.xlu1 }
 0x329   : > { %1761 = vmatmul.mubr.msk.bf16.vlgmr.msra.gmra.mrb[8].mxu1 %vm480_vm4, %v741_v21  ;;  %v757_v29 = vpop.trf.xlu0 }
 0x32a   : > { %861 = vmatprep.mubr.bf16.mxu1 %v2932_v1 }
 0x32c   : > { %v742_v22 = vpop.trf.xlu1 }
 0x32d   : > { %v758_v30 = vpop.trf.xlu0 }
 0x330   : > { %v743_v23 = vpop.trf.xlu1 }
 0x331   : > { %1762 = vmatmul.mubr.msk.bf16.gmra.mrb[12].mxu1 %vm480_vm4, %v742_v22  ;;  %v759_v31 = vpop.trf.xlu0 }
 0x332   : > { %871 = vmatprep.mubr.bf16.mxu1 %v2932_v1 }
 0x334   : > { %v744_v24 = vpop.trf.xlu1 }
 0x335   : > { %v760_v32 = vpop.trf.xlu0 }
 0x338   : > { %v745_v25 = vpop.trf.xlu1 }
 0x339   : > { %1763 = vmatmul.mubr.msk.bf16.gmra.mrb[16].mxu1 %vm480_vm4, %v743_v23  ;;  %v761_v33 = vpop.trf.xlu0 }
 0x33a   : > { %881 = vmatprep.mubr.bf16.mxu1 %v2932_v1 }
 0x33c   : > { %v746_v26 = vpop.trf.xlu1 }
 0x33d   : > { %v762_v34 = vpop.trf.xlu0 }
 0x340   : > { %v747_v27 = vpop.trf.xlu1 }
 0x341   : > { %1764 = vmatmul.mubr.msk.bf16.gmra.mrb[20].mxu1 %vm480_vm4, %v744_v24  ;;  %v763_v35 = vpop.trf.xlu0 }
 0x342   : > { %891 = vmatprep.mubr.bf16.mxu1 %v2932_v1 }
 0x344   : > { %v748_v28 = vpop.trf.xlu1 }
 0x345   : > { %v764_v36 = vpop.trf.xlu0 }
 0x349   : > { %1765 = vmatmul.mubr.msk.bf16.gmra.mrb[24].mxu1 %vm480_vm4, %v745_v25 }
 0x34a   : > { %901 = vmatprep.mubr.bf16.mxu1 %v2932_v1 }
 0x351   : > { %1766 = vmatmul.mubr.msk.bf16.gmra.mrb[28].mxu1 %vm480_vm4, %v746_v26 }
 0x352   : > { %911 = vmatprep.mubr.bf16.mxu1 %v2932_v1 }
 0x359   : > { %1767 = vmatmul.mubr.msk.bf16.gmra.mrb[32].mxu1 %vm480_vm4, %v747_v27 }
 0x35a   : > { %921 = vmatprep.mubr.bf16.mxu1 %v2932_v1 }
 0x361   : > { %1768 = vmatmul.mubr.msk.bf16.gmra.mrb[36].mxu1 %vm480_vm4, %v748_v28 }
 0x362   : > { %931 = vmatprep.mubr.bf16.mxu1 %v2932_v1 }
 0x369   : > { %1769 = vmatmul.mubr.msk.bf16.gmra.mrb[40].mxu1 %vm480_vm4, %v757_v29 }
 0x36a   : > { %941 = vmatprep.mubr.bf16.mxu1 %v2932_v1 }
 0x371   : > { %1770 = vmatmul.mubr.msk.bf16.gmra.mrb[44].mxu1 %vm480_vm4, %v758_v30 }
 0x372   : > { %951 = vmatprep.mubr.bf16.mxu1 %v2932_v1 }
 0x379   : > { %1771 = vmatmul.mubr.msk.bf16.gmra.mrb[48].mxu1 %vm480_vm4, %v759_v31 }
 0x37a   : > { %961 = vmatprep.mubr.bf16.mxu1 %v2932_v1 }
 0x381   : > { %1772 = vmatmul.mubr.msk.bf16.gmra.mrb[52].mxu1 %vm480_vm4, %v760_v32 }
 0x382   : > { %971 = vmatprep.mubr.bf16.mxu1 %v2932_v1 }
 0x389   : > { %1773 = vmatmul.mubr.msk.bf16.gmra.mrb[56].mxu1 %vm480_vm4, %v761_v33 }
 0x38a   : > { %981 = vmatprep.mubr.bf16.mxu1 %v2932_v1 }
 0x391   : > { %1774 = vmatmul.mubr.msk.bf16.gmra.mrb[60].mxu1 %vm480_vm4, %v762_v34 }
 0x392   : > { %991 = vmatprep.mubr.bf16.mxu1 %v2932_v1 }
 0x399   : > { %1775 = vmatmul.mubr.msk.bf16.gmra.mrb[64].mxu1 %vm480_vm4, %v763_v35 }
 0x39a   : > { %1001 = vmatprep.mubr.bf16.mxu1 %v2932_v1 }
 0x3a1   : > { %1776 = vmatmul.mubr.msk.bf16.gmra.mrb[68].mxu1 %vm480_vm4, %v764_v36 }
 0x3a2   : > { %1635 = vmatprep.mubr.bf16.mxu1 %v2932_v1  ;;  %v2975_v1 = vmov 0  }
 0x3fc   : > { %v2280_v37 = vpop.f32.mrb[8].mxu1 }
 0x3fd   : > { %v2282_v38 = vpop.f32.mrb[9].mxu1 }
 0x3fe   : > { %v2284_v39 = vpop.f32.mrb[10].mxu1  ;;  %v1012_v40 = vmax.f32 %v2280_v37, %v2282_v38 }
 0x3ff   : > { %v2288_v41 = vpop.f32.mrb[11].mxu1 }
 0x400   : > { %1013 = vmax.xlane.f32.xlu0 %v1012_v40  ;;  %v1015_v42 = vmax.f32 %v2284_v39, %v2288_v41 }
 0x402   : > { %1016 = vmax.xlane.f32.xlu1 %v1015_v42 }
 0x404   : > { %v2292_v43 = vpop.f32.mrb[12].mxu1 }
 0x405   : > { %v2294_v44 = vpop.f32.mrb[13].mxu1 }
 0x406   : > { %v2296_v45 = vpop.f32.mrb[14].mxu1  ;;  %v1018_v46 = vmax.f32 %v2292_v43, %v2294_v44 }
 0x407   : > { %v2300_v47 = vpop.f32.mrb[15].mxu1 }
 0x408   : > { %1019 = vmax.xlane.f32.xlu0 %v1018_v46  ;;  %v1021_v48 = vmax.f32 %v2296_v45, %v2300_v47 }
 0x40a   : > { %1022 = vmax.xlane.f32.xlu1 %v1021_v48 }
 0x40c   : > { %v2304_v49 = vpop.f32.mrb[16].mxu1 }
 0x40d   : > { %v2306_v50 = vpop.f32.mrb[17].mxu1 }
 0x40e   : > { %v2308_v51 = vpop.f32.mrb[18].mxu1  ;;  %v1024_v52 = vmax.f32 %v2304_v49, %v2306_v50 }
 0x40f   : > { %v2312_v53 = vpop.f32.mrb[19].mxu1 }
 0x410   : > { %1025 = vmax.xlane.f32.xlu0 %v1024_v52  ;;  %v1027_v54 = vmax.f32 %v2308_v51, %v2312_v53 }
 0x412   : > { %1028 = vmax.xlane.f32.xlu1 %v1027_v54 }
 0x414   : > { %v2316_v55 = vpop.f32.mrb[20].mxu1 }
 0x415   : > { %v2318_v56 = vpop.f32.mrb[21].mxu1 }
 0x416   : > { %v2320_v57 = vpop.f32.mrb[22].mxu1  ;;  %v1030_v58 = vmax.f32 %v2316_v55, %v2318_v56 }
 0x417   : > { %v2324_v59 = vpop.f32.mrb[23].mxu1 }
 0x418   : > { %1031 = vmax.xlane.f32.xlu0 %v1030_v58  ;;  %v1033_v60 = vmax.f32 %v2320_v57, %v2324_v59 }
 0x41a   : > { %1034 = vmax.xlane.f32.xlu1 %v1033_v60 }
 0x41c   : > { %v2328_v61 = vpop.f32.mrb[24].mxu1 }
 0x41d   : > { %v2330_v62 = vpop.f32.mrb[25].mxu1 }
 0x41e   : > { %v2332_v63 = vpop.f32.mrb[26].mxu1  ;;  %v1036_v0 = vmax.f32 %v2328_v61, %v2330_v62 }
 0x41f   : > { %v2336_v2 = vpop.f32.mrb[27].mxu1 }
 0x420   : > { %1037 = vmax.xlane.f32.xlu0 %v1036_v0  ;;  %v1039_v3 = vmax.f32 %v2332_v63, %v2336_v2 }
 0x422   : > { %1040 = vmax.xlane.f32.xlu1 %v1039_v3 }
 0x424   : > { %v2340_v4 = vpop.f32.mrb[28].mxu1 }
 0x425   : > { %v2342_v5 = vpop.f32.mrb[29].mxu1 }
 0x426   : > { %v2344_v6 = vpop.f32.mrb[30].mxu1  ;;  %v1042_v7 = vmax.f32 %v2340_v4, %v2342_v5 }
 0x427   : > { %v2348_v8 = vpop.f32.mrb[31].mxu1 }
 0x428   : > { %1043 = vmax.xlane.f32.xlu0 %v1042_v7  ;;  %v1045_v9 = vmax.f32 %v2344_v6, %v2348_v8 }
 0x42a   : > { %1046 = vmax.xlane.f32.xlu1 %v1045_v9 }
 0x42c   : > { %v2352_v10 = vpop.f32.mrb[32].mxu1 }
 0x42d   : > { %v2354_v11 = vpop.f32.mrb[33].mxu1 }
 0x42e   : > { %v2356_v12 = vpop.f32.mrb[34].mxu1  ;;  %v1048_v13 = vmax.f32 %v2352_v10, %v2354_v11 }
 0x42f   : > { %v2360_v14 = vpop.f32.mrb[35].mxu1 }
 0x430   : > { %1049 = vmax.xlane.f32.xlu0 %v1048_v13  ;;  %v1051_v15 = vmax.f32 %v2356_v12, %v2360_v14 }
 0x432   : > { %1052 = vmax.xlane.f32.xlu1 %v1051_v15 }
 0x434   : > { %v2364_v16 = vpop.f32.mrb[36].mxu1 }
 0x435   : > { %v2366_v17 = vpop.f32.mrb[37].mxu1 }
 0x436   : > { %v2368_v18 = vpop.f32.mrb[38].mxu1  ;;  %v1054_v19 = vmax.f32 %v2364_v16, %v2366_v17 }
 0x437   : > { %v2372_v20 = vpop.f32.mrb[39].mxu1 }
 0x438   : > { %1055 = vmax.xlane.f32.xlu0 %v1054_v19  ;;  %v1057_v21 = vmax.f32 %v2368_v18, %v2372_v20 }
 0x43a   : > { %1058 = vmax.xlane.f32.xlu1 %v1057_v21 }
 0x43c   : > { %v2376_v22 = vpop.f32.mrb[40].mxu1 }
 0x43d   : > { %v2378_v23 = vpop.f32.mrb[41].mxu1 }
 0x43e   : > { %v2380_v24 = vpop.f32.mrb[42].mxu1  ;;  %v1060_v25 = vmax.f32 %v2376_v22, %v2378_v23 }
 0x43f   : > { %v2384_v26 = vpop.f32.mrb[43].mxu1 }
 0x440   : > { %1061 = vmax.xlane.f32.xlu0 %v1060_v25  ;;  %v1063_v27 = vmax.f32 %v2380_v24, %v2384_v26 }
 0x442   : > { %1064 = vmax.xlane.f32.xlu1 %v1063_v27 }
 0x444   : > { %v2388_v28 = vpop.f32.mrb[44].mxu1 }
 0x445   : > { %v2390_v29 = vpop.f32.mrb[45].mxu1 }
 0x446   : > { %2962 = vst [vmem:[#allocation6_spill] sm:$0xff] %v2390_v29  ;;  %v2392_v30 = vpop.f32.mrb[46].mxu1  ;;  %v1066_v31 = vmax.f32 %v2388_v28, %v2390_v29 }
 0x447   : > { %2963 = vst [vmem:[#allocation7_spill] sm:$0xff] %v2392_v30  ;;  %v2396_v32 = vpop.f32.mrb[47].mxu1 }
 0x448   : > { %2964 = vst [vmem:[#allocation8_spill] sm:$0xff] %v2396_v32  ;;  %1067 = vmax.xlane.f32.xlu0 %v1066_v31  ;;  %v1069_v33 = vmax.f32 %v2392_v30, %v2396_v32 }
 0x44a   : > { %1070 = vmax.xlane.f32.xlu1 %v1069_v33 }
 0x44c   : > { %v2400_v34 = vpop.f32.mrb[48].mxu1 }
 0x44d   : > { %2965 = vst [vmem:[#allocation9_spill] sm:$0xff] %v2400_v34  ;;  %v2402_v35 = vpop.f32.mrb[49].mxu1 }
 0x44e   : > { %2966 = vst [vmem:[#allocation10_spill] sm:$0xff] %v2402_v35  ;;  %v2404_v36 = vpop.f32.mrb[50].mxu1  ;;  %v1072_v40 = vmax.f32 %v2400_v34, %v2402_v35 }
 0x44f   : > { %2967 = vst [vmem:[#allocation11_spill] sm:$0xff] %v2404_v36  ;;  %v2408_v42 = vpop.f32.mrb[51].mxu1 }
 0x450   : > { %2968 = vst [vmem:[#allocation12_spill] sm:$0xff] %v2408_v42  ;;  %1073 = vmax.xlane.f32.xlu0 %v1072_v40  ;;  %v1075_v46 = vmax.f32 %v2404_v36, %v2408_v42 }
 0x452   : > { %1076 = vmax.xlane.f32.xlu1 %v1075_v46 }
 0x454   : > { %v2412_v48 = vpop.f32.mrb[52].mxu1 }
 0x455   : > { %2969 = vst [vmem:[#allocation13_spill] sm:$0xff] %v2412_v48  ;;  %v2414_v52 = vpop.f32.mrb[53].mxu1 }
 0x456   : > { %2970 = vst [vmem:[#allocation14_spill] sm:$0xff] %v2414_v52  ;;  %v2416_v54 = vpop.f32.mrb[54].mxu1  ;;  %v1078_v58 = vmax.f32 %v2412_v48, %v2414_v52  ;;  %v1840_v52 = vld [vmem:[%s2927_s5 + $0x10] sm:$0xff]  }
 0x457   : > { %2971 = vst [vmem:[#allocation15_spill] sm:$0xff] %v2416_v54  ;;  %v2420_v60 = vpop.f32.mrb[55].mxu1 }
 0x458   : > { %2972 = vst [vmem:[#allocation16_spill] sm:$0xff] %v2420_v60  ;;  %1079 = vmax.xlane.f32.xlu0 %v1078_v58  ;;  %v1081_v0 = vmax.f32 %v2416_v54, %v2420_v60 }
 0x45a   : > { %1082 = vmax.xlane.f32.xlu1 %v1081_v0 }
 0x45c   : > { %v2424_v3 = vpop.f32.mrb[56].mxu1 }
 0x45d   : > { %v2426_v7 = vpop.f32.mrb[57].mxu1 }
 0x45e   : > { %v2428_v9 = vpop.f32.mrb[58].mxu1 }
 0x45f   : > { %2973 = vst [vmem:[#allocation17_spill] sm:$0xff] %v2428_v9  ;;  %v2432_v15 = vpop.f32.mrb[59].mxu1 }
 0x460   : > { %2974 = vst [vmem:[#allocation18_spill] sm:$0xff] %v2432_v15  ;;  %v1087_v19 = vmax.f32 %v2428_v9, %v2432_v15 }
 0x462   : > { %1088 = vmax.xlane.f32.xlu1 %v1087_v19  ;;  %v1839_v19 = vld [vmem:[%s2927_s5 + $0x8] sm:$0xff]  }
 0x463   : > { %1758 = vmatmul.mubr.msk.bf16.gmra.mrb[12].mxu0 %vm652_vm5, %v1839_v19 }
 0x464   : > { %v2436_v21 = vpop.f32.mrb[60].mxu1  ;;  %714 = vmatprep.mubr.bf16.mxu0 %v2975_v1 }
 0x465   : > { %v2438_v25 = vpop.f32.mrb[61].mxu1 }
 0x466   : > { %v2440_v27 = vpop.f32.mrb[62].mxu1 }
 0x467   : > { %v2444_v33 = vpop.f32.mrb[63].mxu1 }
 0x46b   : > { %1759 = vmatmul.mubr.msk.bf16.gmra.mrb[16].mxu0 %vm652_vm5, %v1840_v52 }
 0x46c   : > { %v2448_v46 = vpop.f32.mrb[64].mxu1 }
 0x46d   : > { %v2450_v58 = vpop.f32.mrb[65].mxu1 }
 0x46e   : > { %v2452_v0 = vpop.f32.mrb[66].mxu1 }
 0x46f   : > { %v2456_v13 = vpop.f32.mrb[67].mxu1 }
 0x474   : > { %v2460_v31 = vpop.f32.mrb[68].mxu1 }
 0x475   : > { %v2462_v15 = vpop.f32.mrb[69].mxu1 }
 0x476   : > { %v2464_v9 = vpop.f32.mrb[70].mxu1 }
 0x477   : > { %v2468_v60 = vpop.f32.mrb[71].mxu1 }
 0x48d   : > { %v1014_v40 = vpop.xlane.xlu0 %1013 }
 0x48e   : > { %v1108_v48 = vsub.f32 %v2280_v37, %v1014_v40  ;;  %v1109_v42 = vsub.f32 %v2282_v38, %v1014_v40 }
 0x48f   : > { %v1017_v54 = vpop.xlane.xlu1 %1016 }
 0x490   : > { %v1172_v36 = vmul.f32 1.442695, %v1108_v48  ;;  %v1174_v35 = vmul.f32 1.442695, %v1109_v42  ;;  %v1110_v34 = vsub.f32 %v2284_v39, %v1017_v54  ;;  %v1111_v19 = vsub.f32 %v2288_v41, %v1017_v54 }
 0x492   : > { %1842 = vpow2.f32 %v1172_v36  ;;  %v1176_v1 = vmul.f32 1.442695, %v1110_v34  ;;  %v1178_v32 = vmul.f32 1.442695, %v1111_v19 }
 0x493   : > { %1844 = vpow2.f32 %v1174_v35 }
 0x494   : > { %1846 = vpow2.f32 %v1176_v1 }
 0x495   : > { %1848 = vpow2.f32 %v1178_v32  ;;  %v1020_v30 = vpop.xlane.xlu0 %1019 }
 0x496   : > { %v1112_v52 = vsub.f32 %v2292_v43, %v1020_v30  ;;  %v1113_v37 = vsub.f32 %v2294_v44, %v1020_v30 }
 0x497   : > { %v1023_v29 = vpop.xlane.xlu1 %1022 }
 0x498   : > { %v1180_v38 = vmul.f32 1.442695, %v1112_v52  ;;  %v1182_v40 = vmul.f32 1.442695, %v1113_v37  ;;  %v1114_v42 = vsub.f32 %v2296_v45, %v1023_v29  ;;  %v1115_v39 = vsub.f32 %v2300_v47, %v1023_v29 }
 0x49a   : > { %1850 = vpow2.f32 %v1180_v38  ;;  %v1184_v41 = vmul.f32 1.442695, %v1114_v42  ;;  %v1186_v36 = vmul.f32 1.442695, %v1115_v39  ;;  %v2976_v38 = vmax.f32 %v2424_v3, %v2426_v7 }
 0x49b   : > { %1852 = vpow2.f32 %v1182_v40 }
 0x49c   : > { %v2489_v34 = vpop.eup %1842  ;;  %1854 = vpow2.f32 %v1184_v41 }
 0x49d   : > { %v2491_v32 = vpop.eup %1844  ;;  %1856 = vpow2.f32 %v1186_v36  ;;  %v1026_v43 = vpop.xlane.xlu0 %1025 }
 0x49e   : > { %v2493_v35 = vpop.eup %1846  ;;  %v1116_v44 = vsub.f32 %v2304_v49, %v1026_v43  ;;  %v1117_v30 = vsub.f32 %v2306_v50, %v1026_v43  ;;  %v1300_v45 = vadd.f32 %v2491_v32, %v2489_v34  ;;  %v2977_v43 = vmax.f32 %v2440_v27, %v2444_v33 }
 0x49f   : > { %v2499_v47 = vpop.eup %1848  ;;  %v1029_v29 = vpop.xlane.xlu1 %1028 }
 0x4a0   : > { %v1188_v48 = vmul.f32 1.442695, %v1116_v44  ;;  %v1190_v54 = vmul.f32 1.442695, %v1117_v30  ;;  %v1118_v19 = vsub.f32 %v2308_v51, %v1029_v29  ;;  %v1119_v1 = vsub.f32 %v2312_v53, %v1029_v29  ;;  %1301 = vadd.xlane.f32.xlu0 %v1300_v45 }
 0x4a1   : > { %v1303_v52 = vadd.f32 %v2499_v47, %v2493_v35 }
 0x4a2   : > { %1858 = vpow2.f32 %v1188_v48  ;;  %v1192_v49 = vmul.f32 1.442695, %v1118_v19  ;;  %v1194_v37 = vmul.f32 1.442695, %v1119_v1  ;;  %v2978_v1 = vmax.f32 %v2436_v21, %v2438_v25 }
 0x4a3   : > { %1860 = vpow2.f32 %v1190_v54  ;;  %1304 = vadd.xlane.f32.xlu1 %v1303_v52 }
 0x4a4   : > { %v2505_v50 = vpop.eup %1850  ;;  %1862 = vpow2.f32 %v1192_v49  ;;  %1085 = vmax.xlane.f32.xlu0 %v2976_v38 }
 0x4a5   : > { %v2510_v40 = vpop.eup %1852  ;;  %1864 = vpow2.f32 %v1194_v37  ;;  %v1032_v51 = vpop.xlane.xlu0 %1031 }
 0x4a6   : > { %v2512_v53 = vpop.eup %1854  ;;  %v1120_v42 = vsub.f32 %v2316_v55, %v1032_v51  ;;  %v1121_v39 = vsub.f32 %v2318_v56, %v1032_v51  ;;  %v1306_v41 = vadd.f32 %v2510_v40, %v2505_v50 }
 0x4a7   : > { %v2518_v36 = vpop.eup %1856  ;;  %1094 = vmax.xlane.f32.xlu1 %v2977_v43  ;;  %v1035_v44 = vpop.xlane.xlu1 %1034 }
 0x4a8   : > { %v1196_v30 = vmul.f32 1.442695, %v1120_v42  ;;  %v1198_v45 = vmul.f32 1.442695, %v1121_v39  ;;  %v1122_v29 = vsub.f32 %v2320_v57, %v1035_v44  ;;  %v1123_v48 = vsub.f32 %v2324_v59, %v1035_v44  ;;  %1307 = vadd.xlane.f32.xlu0 %v1306_v41 }
 0x4a9   : > { %v1309_v55 = vadd.f32 %v2518_v36, %v2512_v53  ;;  %v2979_v42 = vmax.f32 %v2452_v0, %v2456_v13 }
 0x4aa   : > { %1866 = vpow2.f32 %v1196_v30  ;;  %v1200_v56 = vmul.f32 1.442695, %v1122_v29  ;;  %v1202_v54 = vmul.f32 1.442695, %v1123_v48  ;;  %v2980_v48 = vmax.f32 %v2448_v46, %v2450_v58 }
 0x4ab   : > { %1868 = vpow2.f32 %v1198_v45  ;;  %1310 = vadd.xlane.f32.xlu1 %v1309_v55 }
 0x4ac   : > { %v2527_v19 = vpop.eup %1858  ;;  %1870 = vpow2.f32 %v1200_v56  ;;  %1091 = vmax.xlane.f32.xlu0 %v2978_v1 }
 0x4ad   : > { %v2532_v52 = vpop.eup %1860  ;;  %1872 = vpow2.f32 %v1202_v54  ;;  %v1038_v57 = vpop.xlane.xlu0 %1037 }
 0x4ae   : > { %v2534_v59 = vpop.eup %1862  ;;  %v1124_v49 = vsub.f32 %v2328_v61, %v1038_v57  ;;  %v1125_v37 = vsub.f32 %v2330_v62, %v1038_v57  ;;  %v1312_v38 = vadd.f32 %v2532_v52, %v2527_v19 }
 0x4af   : > { %v2540_v51 = vpop.eup %1864  ;;  %1100 = vmax.xlane.f32.xlu1 %v2979_v42  ;;  %v1041_v39 = vpop.xlane.xlu1 %1040 }
 0x4b0   : > { %v1204_v41 = vmul.f32 1.442695, %v1124_v49  ;;  %v1206_v43 = vmul.f32 1.442695, %v1125_v37  ;;  %v1126_v44 = vsub.f32 %v2332_v63, %v1041_v39  ;;  %v1127_v30 = vsub.f32 %v2336_v2, %v1041_v39  ;;  %1313 = vadd.xlane.f32.xlu0 %v1312_v38 }
 0x4b1   : > { %v1315_v61 = vadd.f32 %v2540_v51, %v2534_v59  ;;  %v2981_v49 = vmax.f32 %v2464_v9, %v2468_v60 }
 0x4b2   : > { %1874 = vpow2.f32 %v1204_v41  ;;  %v1208_v62 = vmul.f32 1.442695, %v1126_v44  ;;  %v1210_v45 = vmul.f32 1.442695, %v1127_v30  ;;  %v2982_v30 = vmax.f32 %v2460_v31, %v2462_v15 }
 0x4b3   : > { %1876 = vpow2.f32 %v1206_v43  ;;  %1316 = vadd.xlane.f32.xlu1 %v1315_v61 }
 0x4b4   : > { %v2549_v29 = vpop.eup %1866  ;;  %1878 = vpow2.f32 %v1208_v62  ;;  %1097 = vmax.xlane.f32.xlu0 %v2980_v48 }
 0x4b5   : > { %v2554_v55 = vpop.eup %1868  ;;  %1880 = vpow2.f32 %v1210_v45  ;;  %v1044_v63 = vpop.xlane.xlu0 %1043 }
 0x4b6   : > { %v2556_v2 = vpop.eup %1870  ;;  %v1128_v56 = vsub.f32 %v2340_v4, %v1044_v63  ;;  %v1129_v54 = vsub.f32 %v2342_v5, %v1044_v63  ;;  %v1318_v1 = vadd.f32 %v2554_v55, %v2549_v29 }
 0x4b7   : > { %v2562_v57 = vpop.eup %1872  ;;  %1106 = vmax.xlane.f32.xlu1 %v2981_v49  ;;  %v1047_v37 = vpop.xlane.xlu1 %1046 }
 0x4b8   : > { %v1212_v38 = vmul.f32 1.442695, %v1128_v56  ;;  %v1214_v42 = vmul.f32 1.442695, %v1129_v54  ;;  %v1130_v39 = vsub.f32 %v2344_v6, %v1047_v37  ;;  %v1131_v41 = vsub.f32 %v2348_v8, %v1047_v37  ;;  %1319 = vadd.xlane.f32.xlu0 %v1318_v1 }
 0x4b9   : > { %v1321_v4 = vadd.f32 %v2562_v57, %v2556_v2 }
 0x4ba   : > { %1882 = vpow2.f32 %v1212_v38  ;;  %v1216_v5 = vmul.f32 1.442695, %v1130_v39  ;;  %v1218_v43 = vmul.f32 1.442695, %v1131_v41 }
 0x4bb   : > { %1884 = vpow2.f32 %v1214_v42  ;;  %1322 = vadd.xlane.f32.xlu1 %v1321_v4 }
 0x4bc   : > { %v2571_v44 = vpop.eup %1874  ;;  %1886 = vpow2.f32 %v1216_v5  ;;  %1103 = vmax.xlane.f32.xlu0 %v2982_v30 }
 0x4bd   : > { %v2576_v61 = vpop.eup %1876  ;;  %1888 = vpow2.f32 %v1218_v43  ;;  %v1050_v6 = vpop.xlane.xlu0 %1049 }
 0x4be   : > { %v2578_v8 = vpop.eup %1878  ;;  %v1132_v62 = vsub.f32 %v2352_v10, %v1050_v6  ;;  %v1133_v45 = vsub.f32 %v2354_v11, %v1050_v6  ;;  %v1324_v48 = vadd.f32 %v2576_v61, %v2571_v44 }
 0x4bf   : > { %v2584_v63 = vpop.eup %1880  ;;  %v1053_v56 = vpop.xlane.xlu1 %1052 }
 0x4c0   : > { %v1220_v54 = vmul.f32 1.442695, %v1132_v62  ;;  %v1222_v1 = vmul.f32 1.442695, %v1133_v45  ;;  %v1134_v49 = vsub.f32 %v2356_v12, %v1053_v56  ;;  %v1135_v37 = vsub.f32 %v2360_v14, %v1053_v56  ;;  %1325 = vadd.xlane.f32.xlu0 %v1324_v48 }
 0x4c1   : > { %v1327_v38 = vadd.f32 %v2584_v63, %v2578_v8 }
 0x4c2   : > { %1890 = vpow2.f32 %v1220_v54  ;;  %v1224_v10 = vmul.f32 1.442695, %v1134_v49  ;;  %v1226_v42 = vmul.f32 1.442695, %v1135_v37 }
 0x4c3   : > { %1892 = vpow2.f32 %v1222_v1  ;;  %1328 = vadd.xlane.f32.xlu1 %v1327_v38 }
 0x4c4   : > { %v2590_v11 = vpop.eup %1882  ;;  %1894 = vpow2.f32 %v1224_v10 }
 0x4c5   : > { %v2592_v39 = vpop.eup %1884  ;;  %1896 = vpow2.f32 %v1226_v42  ;;  %v1056_v41 = vpop.xlane.xlu0 %1055 }
 0x4c6   : > { %v2594_v4 = vpop.eup %1886  ;;  %v1136_v12 = vsub.f32 %v2364_v16, %v1056_v41  ;;  %v1137_v14 = vsub.f32 %v2366_v17, %v1056_v41  ;;  %v1330_v5 = vadd.f32 %v2592_v39, %v2590_v11 }
 0x4c7   : > { %v2600_v43 = vpop.eup %1888  ;;  %v1059_v30 = vpop.xlane.xlu1 %1058 }
 0x4c8   : > { %v1228_v6 = vmul.f32 1.442695, %v1136_v12  ;;  %v1230_v62 = vmul.f32 1.442695, %v1137_v14  ;;  %v1138_v45 = vsub.f32 %v2368_v18, %v1059_v30  ;;  %v1139_v48 = vsub.f32 %v2372_v20, %v1059_v30  ;;  %1331 = vadd.xlane.f32.xlu0 %v1330_v5 }
 0x4c9   : > { %v1333_v56 = vadd.f32 %v2600_v43, %v2594_v4 }
 0x4ca   : > { %1898 = vpow2.f32 %v1228_v6  ;;  %v1232_v16 = vmul.f32 1.442695, %v1138_v45  ;;  %v1234_v54 = vmul.f32 1.442695, %v1139_v48 }
 0x4cb   : > { %1900 = vpow2.f32 %v1230_v62  ;;  %1334 = vadd.xlane.f32.xlu1 %v1333_v56 }
 0x4cc   : > { %v2606_v17 = vpop.eup %1890  ;;  %1902 = vpow2.f32 %v1232_v16 }
 0x4cd   : > { %v2608_v1 = vpop.eup %1892  ;;  %1904 = vpow2.f32 %v1234_v54  ;;  %v1062_v49 = vpop.xlane.xlu0 %1061 }
 0x4ce   : > { %v2610_v37 = vpop.eup %1894  ;;  %v1140_v18 = vsub.f32 %v2376_v22, %v1062_v49  ;;  %v1141_v20 = vsub.f32 %v2378_v23, %v1062_v49  ;;  %v1336_v38 = vadd.f32 %v2608_v1, %v2606_v17 }
 0x4cf   : > { %v2616_v10 = vpop.eup %1896  ;;  %v1065_v42 = vpop.xlane.xlu1 %1064 }
 0x4d0   : > { %v1236_v41 = vmul.f32 1.442695, %v1140_v18  ;;  %v1238_v12 = vmul.f32 1.442695, %v1141_v20  ;;  %v1142_v14 = vsub.f32 %v2380_v24, %v1065_v42  ;;  %v1143_v5 = vsub.f32 %v2384_v26, %v1065_v42  ;;  %1337 = vadd.xlane.f32.xlu0 %v1336_v38  ;;  %v2984_v26 = vld [vmem:[#allocation6_spill] sm:$0xff]  ;;  %v2985_v38 = vld [vmem:[#allocation7_spill] sm:$0xff] }
 0x4d1   : > { %v1339_v30 = vadd.f32 %v2616_v10, %v2610_v37 }
 0x4d2   : > { %1906 = vpow2.f32 %v1236_v41  ;;  %v1240_v22 = vmul.f32 1.442695, %v1142_v14  ;;  %v1242_v6 = vmul.f32 1.442695, %v1143_v5  ;;  %v2986_v41 = vld [vmem:[#allocation8_spill] sm:$0xff] }
 0x4d3   : > { %1908 = vpow2.f32 %v1238_v12  ;;  %1340 = vadd.xlane.f32.xlu1 %v1339_v30 }
 0x4d4   : > { %v2622_v23 = vpop.eup %1898  ;;  %1910 = vpow2.f32 %v1240_v22 }
 0x4d5   : > { %2983 = vst [vmem:[#allocation19_spill] sm:$0xff] %v2622_v23  ;;  %v2624_v62 = vpop.eup %1900  ;;  %1912 = vpow2.f32 %v1242_v6  ;;  %v1068_v45 = vpop.xlane.xlu0 %1067 }
 0x4d6   : > { %v2626_v48 = vpop.eup %1902  ;;  %v1144_v24 = vsub.f32 %v2388_v28, %v1068_v45  ;;  %v1145_v56 = vsub.f32 %v2984_v26, %v1068_v45  ;;  %v1342_v16 = vadd.f32 %v2624_v62, %v2622_v23 }
 0x4d7   : > { %v2632_v54 = vpop.eup %1904  ;;  %v1071_v49 = vpop.xlane.xlu1 %1070 }
 0x4d8   : > { %v1244_v18 = vmul.f32 1.442695, %v1144_v24  ;;  %v1246_v20 = vmul.f32 1.442695, %v1145_v56  ;;  %v1146_v42 = vsub.f32 %v2985_v38, %v1071_v49  ;;  %v1147_v12 = vsub.f32 %v2986_v41, %v1071_v49  ;;  %1343 = vadd.xlane.f32.xlu0 %v1342_v16  ;;  %v2990_v24 = vld [vmem:[#allocation9_spill] sm:$0xff]  ;;  %v2991_v56 = vld [vmem:[#allocation10_spill] sm:$0xff] }
 0x4d9   : > { %v1345_v14 = vadd.f32 %v2632_v54, %v2626_v48  ;;  %v2993_v41 = vld [vmem:[#allocation11_spill] sm:$0xff] }
 0x4da   : > { %1914 = vpow2.f32 %v1244_v18  ;;  %v1248_v28 = vmul.f32 1.442695, %v1146_v42  ;;  %v1250_v5 = vmul.f32 1.442695, %v1147_v12 }
 0x4db   : > { %1916 = vpow2.f32 %v1246_v20  ;;  %1346 = vadd.xlane.f32.xlu1 %v1345_v14  ;;  %v2994_v14 = vld [vmem:[#allocation12_spill] sm:$0xff] }
 0x4dc   : > { %v2638_v30 = vpop.eup %1906  ;;  %1918 = vpow2.f32 %v1248_v28 }
 0x4dd   : > { %2987 = vst [vmem:[#allocation6_spill] sm:$0xff] %v2638_v30  ;;  %v2640_v22 = vpop.eup %1908  ;;  %1920 = vpow2.f32 %v1250_v5  ;;  %v1074_v6 = vpop.xlane.xlu0 %1073 }
 0x4de   : > { %2988 = vst [vmem:[#allocation7_spill] sm:$0xff] %v2640_v22  ;;  %v2642_v45 = vpop.eup %1910  ;;  %v1148_v26 = vsub.f32 %v2990_v24, %v1074_v6  ;;  %v1149_v16 = vsub.f32 %v2991_v56, %v1074_v6  ;;  %v1348_v49 = vadd.f32 %v2640_v22, %v2638_v30  ;;  %v2997_v30 = vld [vmem:[#allocation15_spill] sm:$0xff] }
 0x4df   : > { %2989 = vst [vmem:[#allocation8_spill] sm:$0xff] %v2642_v45  ;;  %v2648_v18 = vpop.eup %1912  ;;  %v1077_v20 = vpop.xlane.xlu1 %1076 }
 0x4e0   : > { %2992 = vst [vmem:[#allocation9_spill] sm:$0xff] %v2648_v18  ;;  %v1252_v38 = vmul.f32 1.442695, %v1148_v26  ;;  %v1254_v42 = vmul.f32 1.442695, %v1149_v16  ;;  %v1150_v12 = vsub.f32 %v2993_v41, %v1077_v20  ;;  %v1151_v28 = vsub.f32 %v2994_v14, %v1077_v20  ;;  %1349 = vadd.xlane.f32.xlu0 %v1348_v49  ;;  %v2995_v41 = vld [vmem:[#allocation13_spill] sm:$0xff] }
 0x4e1   : > { %v1351_v5 = vadd.f32 %v2648_v18, %v2642_v45  ;;  %v2996_v49 = vld [vmem:[#allocation14_spill] sm:$0xff]  ;;  %v2998_v45 = vld [vmem:[#allocation16_spill] sm:$0xff] }
 0x4e2   : > { %1922 = vpow2.f32 %v1252_v38  ;;  %v1256_v24 = vmul.f32 1.442695, %v1150_v12  ;;  %v1258_v23 = vmul.f32 1.442695, %v1151_v28 }
 0x4e3   : > { %1924 = vpow2.f32 %v1254_v42  ;;  %1352 = vadd.xlane.f32.xlu1 %v1351_v5 }
 0x4e4   : > { %v2654_v6 = vpop.eup %1914  ;;  %1926 = vpow2.f32 %v1256_v24 }
 0x4e5   : > { %v2656_v56 = vpop.eup %1916  ;;  %1928 = vpow2.f32 %v1258_v23  ;;  %v1080_v26 = vpop.xlane.xlu0 %1079 }
 0x4e6   : > { %v2658_v16 = vpop.eup %1918  ;;  %v1152_v20 = vsub.f32 %v2995_v41, %v1080_v26  ;;  %v1153_v14 = vsub.f32 %v2996_v49, %v1080_v26  ;;  %v1354_v38 = vadd.f32 %v2656_v56, %v2654_v6 }
 0x4e7   : > { %v2664_v12 = vpop.eup %1920  ;;  %v1083_v42 = vpop.xlane.xlu1 %1082 }
 0x4e8   : > { %v1260_v28 = vmul.f32 1.442695, %v1152_v20  ;;  %v1262_v5 = vmul.f32 1.442695, %v1153_v14  ;;  %v1154_v24 = vsub.f32 %v2997_v30, %v1083_v42  ;;  %v1155_v18 = vsub.f32 %v2998_v45, %v1083_v42  ;;  %1355 = vadd.xlane.f32.xlu0 %v1354_v38  ;;  %v3002_v38 = vld [vmem:[#allocation17_spill] sm:$0xff] }
 0x4e9   : > { %v1357_v23 = vadd.f32 %v2664_v12, %v2658_v16 }
 0x4ea   : > { %1930 = vpow2.f32 %v1260_v28  ;;  %v1264_v41 = vmul.f32 1.442695, %v1154_v24  ;;  %v1266_v22 = vmul.f32 1.442695, %v1155_v18  ;;  %v3003_v28 = vld [vmem:[#allocation18_spill] sm:$0xff] }
 0x4eb   : > { %1932 = vpow2.f32 %v1262_v5  ;;  %1358 = vadd.xlane.f32.xlu1 %v1357_v23 }
 0x4ec   : > { %v2670_v26 = vpop.eup %1922  ;;  %1934 = vpow2.f32 %v1264_v41 }
 0x4ed   : > { %2999 = vst [vmem:[#allocation10_spill] sm:$0xff] %v2670_v26  ;;  %v2672_v49 = vpop.eup %1924  ;;  %1936 = vpow2.f32 %v1266_v22 }
 0x4ee   : > { %3000 = vst [vmem:[#allocation11_spill] sm:$0xff] %v2672_v49  ;;  %v2674_v20 = vpop.eup %1926  ;;  %v1360_v30 = vadd.f32 %v2672_v49, %v2670_v26 }
 0x4ef   : > { %3001 = vst [vmem:[#allocation12_spill] sm:$0xff] %v2674_v20  ;;  %v2678_v45 = vpop.eup %1928  ;;  %v1089_v14 = vpop.xlane.xlu1 %1088 }
 0x4f0   : > { %v1158_v42 = vsub.f32 %v3002_v38, %v1089_v14  ;;  %v1159_v18 = vsub.f32 %v3003_v28, %v1089_v14  ;;  %1361 = vadd.xlane.f32.xlu0 %v1360_v30  ;;  %v1363_v5 = vadd.f32 %v2678_v45, %v2674_v20 }
 0x4f2   : > { %v1272_v24 = vmul.f32 1.442695, %v1158_v42  ;;  %v1274_v23 = vmul.f32 1.442695, %v1159_v18  ;;  %1364 = vadd.xlane.f32.xlu1 %v1363_v5 }
 0x4f4   : > { %v2684_v22 = vpop.eup %1930  ;;  %1938 = vpow2.f32 %v1272_v24 }
 0x4f5   : > { %3004 = vst [vmem:[#allocation13_spill] sm:$0xff] %v2684_v22  ;;  %v2686_v41 = vpop.eup %1932  ;;  %1940 = vpow2.f32 %v1274_v23 }
 0x4f6   : > { %3005 = vst [vmem:[#allocation14_spill] sm:$0xff] %v2686_v41  ;;  %v2688_v26 = vpop.eup %1934  ;;  %v1366_v38 = vadd.f32 %v2686_v41, %v2684_v22 }
 0x4f7   : > { %3006 = vst [vmem:[#allocation15_spill] sm:$0xff] %v2688_v26  ;;  %v2692_v49 = vpop.eup %1936 }
 0x4f8   : > { %3007 = vst [vmem:[#allocation16_spill] sm:$0xff] %v2692_v49  ;;  %1367 = vadd.xlane.f32.xlu0 %v1366_v38  ;;  %v1369_v30 = vadd.f32 %v2692_v49, %v2688_v26 }
 0x4fa   : > { %1370 = vadd.xlane.f32.xlu1 %v1369_v30 }
 0x4fe   : > { %v2696_v14 = vpop.eup %1938 }
 0x4ff   : > { %3008 = vst [vmem:[#allocation17_spill] sm:$0xff] %v2696_v14  ;;  %v2698_v42 = vpop.eup %1940 }
 0x500   : > { %3009 = vst [vmem:[#allocation18_spill] sm:$0xff] %v2698_v42  ;;  %v1375_v28 = vadd.f32 %v2698_v42, %v2696_v14 }
 0x502   : > { %1376 = vadd.xlane.f32.xlu1 %v1375_v28 }
 0x52d   : > { %v1302_v18 = vpop.xlane.xlu0 %1301 }
 0x52e   : > { %1942 = vrcp.f32 %v1302_v18 }
 0x530   : > { %v1305_v5 = vpop.xlane.xlu1 %1304 }
 0x531   : > { %1944 = vrcp.f32 %v1305_v5  ;;  %v1086_v24 = vpop.xlane.xlu0 %1085 }
 0x532   : > { %v1156_v23 = vsub.f32 %v2424_v3, %v1086_v24  ;;  %v1157_v38 = vsub.f32 %v2426_v7, %v1086_v24 }
 0x534   : > { %v1268_v22 = vmul.f32 1.442695, %v1156_v23  ;;  %v1270_v26 = vmul.f32 1.442695, %v1157_v38  ;;  %v1095_v30 = vpop.xlane.xlu1 %1094 }
 0x535   : > { %v1162_v49 = vsub.f32 %v2440_v27, %v1095_v30  ;;  %v1163_v41 = vsub.f32 %v2444_v33, %v1095_v30  ;;  %v1308_v20 = vpop.xlane.xlu0 %1307 }
 0x536   : > { %1946 = vpow2.f32 %v1268_v22 }
 0x537   : > { %1948 = vpow2.f32 %v1270_v26  ;;  %v1280_v28 = vmul.f32 1.442695, %v1162_v49  ;;  %v1282_v14 = vmul.f32 1.442695, %v1163_v41 }
 0x538   : > { %v1943_v18 = vpop.eup %1942  ;;  %1950 = vrcp.f32 %v1308_v20  ;;  %v1311_v5 = vpop.xlane.xlu1 %1310 }
 0x539   : > { %1952 = vpow2.f32 %v1280_v28  ;;  %v1092_v42 = vpop.xlane.xlu0 %1091  ;;  %v1429_v27 = vmul.f32 %v1943_v18, %v2491_v32  ;;  %v1428_v33 = vmul.f32 %v1943_v18, %v2489_v34 }
 0x53a   : > { %1954 = vpow2.f32 %v1282_v14  ;;  %v1160_v3 = vsub.f32 %v2436_v21, %v1092_v42  ;;  %v1161_v7 = vsub.f32 %v2438_v25, %v1092_v42 }
 0x53b   : > { %v1945_v24 = vpop.eup %1944  ;;  %1956 = vrcp.f32 %v1311_v5 }
 0x53c   : > { %v1276_v22 = vmul.f32 1.442695, %v1160_v3  ;;  %v1278_v26 = vmul.f32 1.442695, %v1161_v7  ;;  %v1101_v49 = vpop.xlane.xlu1 %1100  ;;  %v1431_v41 = vmul.f32 %v1945_v24, %v2499_v47  ;;  %v1430_v20 = vmul.f32 %v1945_v24, %v2493_v35 }
 0x53d   : > { %v1166_v23 = vsub.f32 %v2452_v0, %v1101_v49  ;;  %v1167_v14 = vsub.f32 %v2456_v13, %v1101_v49  ;;  %v1314_v21 = vpop.xlane.xlu0 %1313 }
 0x53e   : > { %1958 = vpow2.f32 %v1276_v22  ;;  %v1493_v25 = vpack.c.bf16 %v1431_v41, %v1429_v27  ;;  %v1492_v42 = vpack.c.bf16 %v1430_v20, %v1428_v33 }
 0x53f   : > { %1960 = vpow2.f32 %v1278_v26  ;;  %v1288_v38 = vmul.f32 1.442695, %v1166_v23  ;;  %v1290_v32 = vmul.f32 1.442695, %v1167_v14 }
 0x540   : > { %v2714_v30 = vpop.eup %1946  ;;  %1962 = vrcp.f32 %v1314_v21  ;;  %1524 = vmatprep.subr.bf16.mxu0 %v1493_v25  ;;  %v1317_v34 = vpop.xlane.xlu1 %1316 }
 0x541   : > { %v2716_v28 = vpop.eup %1948  ;;  %1964 = vpow2.f32 %v1288_v38  ;;  %1525 = vmatpush1.bf16.xpose.msra.mxu0 %v1492_v42  ;;  %v1098_v35 = vpop.xlane.xlu0 %1097 }
 0x542   : > { %v1951_v0 = vpop.eup %1950  ;;  %1966 = vpow2.f32 %v1290_v32  ;;  %v1164_v13 = vsub.f32 %v2448_v46, %v1098_v35  ;;  %v1165_v47 = vsub.f32 %v2450_v58, %v1098_v35  ;;  %v1372_v18 = vadd.f32 %v2716_v28, %v2714_v30 }
 0x543   : > { %v2722_v5 = vpop.eup %1952  ;;  %1968 = vrcp.f32 %v1317_v34  ;;  %v1433_v58 = vmul.f32 %v1951_v0, %v2510_v40  ;;  %v1432_v49 = vmul.f32 %v1951_v0, %v2505_v50 }
 0x544   : > { %v2724_v3 = vpop.eup %1954  ;;  %v1284_v7 = vmul.f32 1.442695, %v1164_v13  ;;  %v1286_v24 = vmul.f32 1.442695, %v1165_v47  ;;  %1373 = vadd.xlane.f32.xlu0 %v1372_v18  ;;  %v2726_v27 = vpop.xlane.xlu1 %1106 }
 0x545   : > { %v1957_v33 = vpop.eup %1956  ;;  %v1320_v22 = vpop.xlane.xlu0 %1319  ;;  %v1381_v46 = vadd.f32 %v2724_v3, %v2722_v5 }
 0x546   : > { %1970 = vpow2.f32 %v1284_v7  ;;  %v1435_v26 = vmul.f32 %v1957_v33, %v2518_v36  ;;  %v1434_v41 = vmul.f32 %v1957_v33, %v2512_v53 }
 0x547   : > { %1972 = vpow2.f32 %v1286_v24  ;;  %1382 = vadd.xlane.f32.xlu1 %v1381_v46 }
 0x548   : > { %v2734_v20 = vpop.eup %1958  ;;  %v1495_v23 = vpack.c.bf16 %v1435_v26, %v1433_v58  ;;  %v1323_v14 = vpop.xlane.xlu1 %1322  ;;  %v1494_v21 = vpack.c.bf16 %v1434_v41, %v1432_v49  ;;  %1974 = vrcp.f32 %v1320_v22 }
 0x549   : > { %v2736_v25 = vpop.eup %1960  ;;  %v1104_v42 = vpop.xlane.xlu0 %1103  ;;  %1976 = vrcp.f32 %v1323_v14 }
 0x54a   : > { %v1963_v38 = vpop.eup %1962  ;;  %1526 = vmatprep.subr.bf16.mxu0 %v1495_v23  ;;  %v1168_v40 = vsub.f32 %v2460_v31, %v1104_v42  ;;  %v1169_v36 = vsub.f32 %v2462_v15, %v1104_v42  ;;  %v1378_v50 = vadd.f32 %v2736_v25, %v2734_v20 }
 0x54b   : > { %v2742_v53 = vpop.eup %1964  ;;  %1527 = vmatpush1.bf16.xpose.msra.mxu0 %v1494_v21  ;;  %v1437_v31 = vmul.f32 %v1963_v38, %v2532_v52  ;;  %v1436_v18 = vmul.f32 %v1963_v38, %v2527_v19 }
 0x54c   : > { %v2744_v32 = vpop.eup %1966  ;;  %v1292_v34 = vmul.f32 1.442695, %v1168_v40  ;;  %v1294_v35 = vmul.f32 1.442695, %v1169_v36  ;;  %1379 = vadd.xlane.f32.xlu0 %v1378_v50 }
 0x54d   : > { %v1969_v0 = vpop.eup %1968  ;;  %v1326_v13 = vpop.xlane.xlu0 %1325  ;;  %v1387_v47 = vadd.f32 %v2744_v32, %v2742_v53 }
 0x54e   : > { %1978 = vpow2.f32 %v1292_v34  ;;  %v1439_v15 = vmul.f32 %v1969_v0, %v2540_v51  ;;  %v1438_v7 = vmul.f32 %v1969_v0, %v2534_v59 }
 0x54f   : > { %1980 = vpow2.f32 %v1294_v35  ;;  %1388 = vadd.xlane.f32.xlu1 %v1387_v47  ;;  %v604_v35 = vld [vmem:[%s2928_s6 + $0x18] sm:$0xff] }
 0x550   : > { %v2752_v24 = vpop.eup %1970  ;;  %1982 = vrcp.f32 %v1326_v13  ;;  %v1497_v33 = vpack.c.bf16 %v1439_v15, %v1437_v31  ;;  %v1329_v22 = vpop.xlane.xlu1 %1328  ;;  %v1496_v46 = vpack.c.bf16 %v1438_v7, %v1436_v18 }
 0x551   : > { %v2754_v58 = vpop.eup %1972  ;;  %1984 = vrcp.f32 %v1329_v22  ;;  %v2775_v13 = vpop.f32.mrb[12].mxu0 }
 0x552   : > { %1528 = vmatprep.subr.bf16.mxu0 %v1497_v33  ;;  %v1384_v52 = vadd.f32 %v2754_v58, %v2752_v24  ;;  %v1975_v51 = vpop.eup %1974  ;;  %v2777_v31 = vpop.f32.mrb[13].mxu0 }
 0x553   : > { %1529 = vmatpush1.bf16.xpose.msra.mxu0 %v1496_v46  ;;  %v1977_v19 = vpop.eup %1976  ;;  %v1441_v26 = vmul.f32 %v1975_v51, %v2554_v55  ;;  %v1440_v41 = vmul.f32 %v1975_v51, %v2549_v29  ;;  %v2779_v18 = vpop.f32.mrb[14].mxu0 }
 0x554   : > { %1385 = vadd.xlane.f32.xlu0 %v1384_v52  ;;  %v1443_v49 = vmul.f32 %v1977_v19, %v2562_v57  ;;  %v1442_v23 = vmul.f32 %v1977_v19, %v2556_v2 }
 0x555   : > { %v1332_v59 = vpop.xlane.xlu0 %1331 }
 0x556   : > { %1986 = vrcp.f32 %v1332_v59  ;;  %v1499_v21 = vpack.c.bf16 %v1443_v49, %v1441_v26  ;;  %v1498_v38 = vpack.c.bf16 %v1442_v23, %v1440_v41  ;;  %v1170_v41 = vsub.f32 %v2464_v9, %v2726_v27 }
 0x558   : > { %v2762_v14 = vpop.eup %1978  ;;  %v1335_v42 = vpop.xlane.xlu1 %1334  ;;  %1530 = vmatprep.subr.bf16.mxu0 %v1499_v21  ;;  %v1296_v9 = vmul.f32 1.442695, %v1170_v41 }
 0x559   : > { %v2764_v40 = vpop.eup %1980  ;;  %1988 = vrcp.f32 %v1335_v42 }
 0x55a   : > { %v1983_v36 = vpop.eup %1982  ;;  %v1390_v55 = vadd.f32 %v2764_v40, %v2762_v14 }
 0x55b   : > { %v1985_v50 = vpop.eup %1984  ;;  %1531 = vmatpush1.bf16.xpose.msra.mxu0 %v1498_v38  ;;  %v1445_v29 = vmul.f32 %v1983_v36, %v2576_v61  ;;  %v1444_v0 = vmul.f32 %v1983_v36, %v2571_v44  ;;  %v603_v36 = vld [vmem:[%s2928_s6 + $0x10] sm:$0xff] }
 0x55c   : > { %1391 = vadd.xlane.f32.xlu0 %v1390_v55  ;;  %v1447_v2 = vmul.f32 %v1985_v50, %v2584_v63  ;;  %v1446_v57 = vmul.f32 %v1985_v50, %v2578_v8  ;;  %v2781_v8 = vpop.f32.mrb[15].mxu0 }
 0x55d   : > { %v1338_v34 = vpop.xlane.xlu0 %1337 }
 0x55e   : > { %v1501_v47 = vpack.c.bf16 %v1447_v2, %v1445_v29  ;;  %1990 = vrcp.f32 %v1338_v34  ;;  %v1500_v15 = vpack.c.bf16 %v1446_v57, %v1444_v0  ;;  %v2804_v29 = vpop.f32.mrb[16].mxu0  ;;  %v3010_v57 = vld [vmem:[#allocation19_spill] sm:$0xff] }
 0x560   : > { %624 = vperm.xlu1 %1834, %v604_v35   ;;  %1532 = vmatprep.subr.bf16.mxu0 %v1501_v47  ;;  %v1341_v61 = vpop.xlane.xlu1 %1340  ;;  %v1987_v63 = vpop.eup %1986 }
 0x561   : > { %1992 = vrcp.f32 %v1341_v61  ;;  %v1449_v44 = vmul.f32 %v1987_v63, %v2592_v39  ;;  %v1448_v52 = vmul.f32 %v1987_v63, %v2590_v11  ;;  %v1171_v11 = vsub.f32 %v2468_v60, %v2726_v27  ;;  %v606_v60 = vld [vmem:[%s2928_s6 + $0x28] sm:$0xff]  ;;  %v2807_v35 = vpop.f32.mrb[17].mxu0 }
 0x562   : > { %v2809_v47 = vpop.f32.mrb[18].mxu0 }
 0x563   : > { %v1989_v7 = vpop.eup %1988  ;;  %1533 = vmatpush1.bf16.xpose.msra.mxu0 %v1500_v15 }
 0x564   : > { %v1451_v33 = vmul.f32 %v1989_v7, %v2600_v43  ;;  %v1450_v22 = vmul.f32 %v1989_v7, %v2594_v4  ;;  %v3011_v7 = vld [vmem:[#allocation7_spill] sm:$0xff] }
 0x565   : > { %v1344_v46 = vpop.xlane.xlu0 %1343 }
 0x566   : > { %v1503_v51 = vpack.c.bf16 %v1451_v33, %v1449_v44  ;;  %1994 = vrcp.f32 %v1344_v46  ;;  %v1502_v19 = vpack.c.bf16 %v1450_v22, %v1448_v52  ;;  %v3012_v33 = vld [vmem:[#allocation9_spill] sm:$0xff]  ;;  %v3013_v46 = vld [vmem:[#allocation8_spill] sm:$0xff] }
 0x568   : > { %1534 = vmatprep.subr.bf16.mxu0 %v1503_v51  ;;  %v1347_v59 = vpop.xlane.xlu1 %1346  ;;  %v1991_v26 = vpop.eup %1990 }
 0x569   : > { %1996 = vrcp.f32 %v1347_v59  ;;  %v1453_v39 = vmul.f32 %v1991_v26, %v2608_v1  ;;  %v1452_v21 = vmul.f32 %v1991_v26, %v2606_v17 }
 0x56b   : > { %v1993_v49 = vpop.eup %1992  ;;  %1535 = vmatpush1.bf16.xpose.msra.mxu0 %v1502_v19  ;;  %v3014_v19 = vld [vmem:[#allocation6_spill] sm:$0xff] }
 0x56c   : > { %v1455_v43 = vmul.f32 %v1993_v49, %v2616_v10  ;;  %v1454_v4 = vmul.f32 %v1993_v49, %v2610_v37  ;;  %v1298_v10 = vmul.f32 1.442695, %v1171_v11 }
 0x56d   : > { %v1350_v23 = vpop.xlane.xlu0 %1349 }
 0x56e   : > { %v1505_v42 = vpack.c.bf16 %v1455_v43, %v1453_v39  ;;  %1998 = vrcp.f32 %v1350_v23  ;;  %v1504_v38 = vpack.c.bf16 %v1454_v4, %v1452_v21 }
 0x570   : > { %1536 = vmatprep.subr.bf16.mxu0 %v1505_v42  ;;  %v1353_v1 = vpop.xlane.xlu1 %1352  ;;  %v1995_v55 = vpop.eup %1994 }
 0x571   : > { %2000 = vrcp.f32 %v1353_v1  ;;  %v1457_v17 = vmul.f32 %v1995_v55, %v2624_v62  ;;  %v1456_v34 = vmul.f32 %v1995_v55, %v3010_v57  ;;  %v1584_v62 = vld [vmem:[%s2930_s8 + $0x8] sm:$0xff] }
 0x572   : > { %619 = vperm.xlu0 %1833, %v603_v36   ;;  %2002 = vpow2.f32 %v1296_v9 }
 0x573   : > { %v1997_v37 = vpop.eup %1996  ;;  %1537 = vmatpush1.bf16.xpose.msra.mxu0 %v1504_v38  ;;  %2004 = vpow2.f32 %v1298_v10 }
 0x574   : > { %v1459_v27 = vmul.f32 %v1997_v37, %v2632_v54  ;;  %v1458_v50 = vmul.f32 %v1997_v37, %v2626_v48  ;;  %v2814_v54 = vpop.f32.mrb[19].mxu0 }
 0x575   : > { %v1356_v2 = vpop.xlane.xlu0 %1355 }
 0x576   : > { %634 = vperm.xlu0 %1833, %v606_v60   ;;  %v1507_v0 = vpack.c.bf16 %v1459_v27, %v1457_v17  ;;  %2006 = vrcp.f32 %v1356_v2  ;;  %v1506_v15 = vpack.c.bf16 %v1458_v50, %v1456_v34  ;;  %v3015_v17 = vld [vmem:[#allocation11_spill] sm:$0xff]  ;;  %v3016_v50 = vld [vmem:[#allocation12_spill] sm:$0xff] }
 0x578   : > { %1538 = vmatprep.subr.bf16.mxu0 %v1507_v0  ;;  %v1359_v48 = vpop.xlane.xlu1 %1358  ;;  %v1999_v61 = vpop.eup %1998 }
 0x579   : > { %2008 = vrcp.f32 %v1359_v48  ;;  %v1461_v44 = vmul.f32 %v1999_v61, %v3011_v7  ;;  %v1460_v59 = vmul.f32 %v1999_v61, %v3014_v19  ;;  %v3019_v61 = vld [vmem:[#allocation16_spill] sm:$0xff]  ;;  %v3020_v7 = vld [vmem:[#allocation15_spill] sm:$0xff] }
 0x57a   : > { %1592 = vperm.xlu0 %1833, %v1584_v62   ;;  %v3018_v62 = vld [vmem:[#allocation14_spill] sm:$0xff] }
 0x57b   : > { %v2001_v63 = vpop.eup %2000  ;;  %1539 = vmatpush1.bf16.xpose.msra.mxu0 %v1506_v15  ;;  %v605_v15 = vld [vmem:[%s2928_s6 + $0x20] sm:$0xff] }
 0x57c   : > { %v1463_v22 = vmul.f32 %v2001_v63, %v3012_v33  ;;  %v1462_v52 = vmul.f32 %v2001_v63, %v3013_v46  ;;  %v2820_v26 = vpop.eup %2002  ;;  %v3021_v33 = vld [vmem:[#allocation13_spill] sm:$0xff]  ;;  %v1583_v46 = vld [vmem:[%s2930_s8] sm:$0xff] }
 0x57d   : > { %v1362_v51 = vpop.xlane.xlu0 %1361  ;;  %v2822_v41 = vpop.eup %2004 }
 0x57e   : > { %2010 = vrcp.f32 %v1362_v51  ;;  %v1509_v49 = vpack.c.bf16 %v1463_v22, %v1461_v44  ;;  %v1508_v43 = vpack.c.bf16 %v1462_v52, %v1460_v59  ;;  %v1393_v11 = vadd.f32 %v2822_v41, %v2820_v26 }
 0x57f   : > { %v1365_v39 = vpop.xlane.xlu1 %1364 }
 0x580   : > { %1540 = vmatprep.subr.bf16.mxu0 %v1509_v49  ;;  %2012 = vrcp.f32 %v1365_v39  ;;  %v2007_v4 = vpop.eup %2006 }
 0x581   : > { %v1465_v21 = vmul.f32 %v2007_v4, %v2656_v56  ;;  %v1464_v9 = vmul.f32 %v2007_v4, %v2654_v6 }
 0x583   : > { %v2009_v23 = vpop.eup %2008  ;;  %1541 = vmatpush1.bf16.xpose.msra.mxu0 %v1508_v43 }
 0x584   : > { %1394 = vadd.xlane.f32.xlu1 %v1393_v11  ;;  %v1467_v42 = vmul.f32 %v2009_v23, %v2664_v12  ;;  %v1466_v38 = vmul.f32 %v2009_v23, %v2658_v16  ;;  %v3017_v16 = vld [vmem:[#allocation10_spill] sm:$0xff] }
 0x585   : > { %v1368_v36 = vpop.xlane.xlu0 %1367  ;;  %v3022_v23 = vld [vmem:[#allocation18_spill] sm:$0xff] }
 0x586   : > { %2014 = vrcp.f32 %v1368_v36  ;;  %v1511_v1 = vpack.c.bf16 %v1467_v42, %v1465_v21  ;;  %v1510_v10 = vpack.c.bf16 %v1466_v38, %v1464_v9  ;;  %v3023_v38 = vld [vmem:[#allocation17_spill] sm:$0xff] }
 0x587   : > { %v1371_v55 = vpop.xlane.xlu1 %1370 }
 0x588   : > { %v2011_v37 = vpop.eup %2010  ;;  %1542 = vmatprep.subr.bf16.mxu0 %v1511_v1  ;;  %2016 = vrcp.f32 %v1371_v55 }
 0x589   : > { %v1469_v27 = vmul.f32 %v2011_v37, %v3015_v17  ;;  %v1468_v57 = vmul.f32 %v2011_v37, %v3017_v16 }
 0x58a   : > { %v2013_v60 = vpop.eup %2012 }
 0x58b   : > { %1543 = vmatpush1.bf16.xpose.msra.mxu0 %v1510_v10  ;;  %v1471_v56 = vmul.f32 %v2013_v60, %v2678_v45  ;;  %v1470_v12 = vmul.f32 %v2013_v60, %v3016_v50 }
 0x58d   : > { %v1513_v2 = vpack.c.bf16 %v1471_v56, %v1469_v27  ;;  %v1512_v6 = vpack.c.bf16 %v1470_v12, %v1468_v57 }
 0x58f   : > { %1544 = vmatprep.subr.bf16.mxu0 %v1513_v2  ;;  %v1377_v51 = vpop.xlane.xlu1 %1376 }
 0x590   : > { %v2015_v34 = vpop.eup %2014  ;;  %2018 = vrcp.f32 %v1377_v51 }
 0x591   : > { %v1473_v48 = vmul.f32 %v2015_v34, %v3018_v62  ;;  %v1472_v22 = vmul.f32 %v2015_v34, %v3021_v33 }
 0x592   : > { %v2017_v0 = vpop.eup %2016 }
 0x593   : > { %1545 = vmatpush1.bf16.xpose.msra.mxu0 %v1512_v6  ;;  %v1475_v63 = vmul.f32 %v2017_v0, %v3019_v61  ;;  %v1474_v45 = vmul.f32 %v2017_v0, %v3020_v7 }
 0x595   : > { %629 = vperm.xlu1 %1834, %v605_v15   ;;  %v1515_v44 = vpack.c.bf16 %v1475_v63, %v1473_v48  ;;  %v1514_v52 = vpack.c.bf16 %v1474_v45, %v1472_v22 }
 0x597   : > { %1546 = vmatprep.subr.bf16.mxu0 %v1515_v44 }
 0x599   : > { %1587 = vperm.xlu1 %1834, %v1583_v46  }
 0x59a   : > { %v2019_v39 = vpop.eup %2018 }
 0x59b   : > { %1547 = vmatpush1.bf16.xpose.msra.mxu0 %v1514_v52  ;;  %v1479_v21 = vmul.f32 %v2019_v39, %v3022_v23  ;;  %v1478_v36 = vmul.f32 %v2019_v39, %v3023_v38 }
 0x5d1   : > { %v1374_v19 = vpop.xlane.xlu0 %1373 }
 0x5d2   : > { %2020 = vrcp.f32 %v1374_v19 }
 0x5d4   : > { %v1383_v59 = vpop.xlane.xlu1 %1382 }
 0x5d5   : > { %2022 = vrcp.f32 %v1383_v59 }
 0x5d9   : > { %v1380_v49 = vpop.xlane.xlu0 %1379 }
 0x5da   : > { %2024 = vrcp.f32 %v1380_v49 }
 0x5dc   : > { %v2021_v43 = vpop.eup %2020  ;;  %v1389_v4 = vpop.xlane.xlu1 %1388 }
 0x5dd   : > { %v1477_v11 = vmul.f32 %v2021_v43, %v2716_v28  ;;  %v1476_v42 = vmul.f32 %v2021_v43, %v2714_v30  ;;  %2026 = vrcp.f32 %v1389_v4  ;;  %v1841_v4 = vld [vmem:[%s2929_s7] sm:$0xff]  }
 0x5df   : > { %v1517_v9 = vpack.c.bf16 %v1479_v21, %v1477_v11  ;;  %v1516_v1 = vpack.c.bf16 %v1478_v36, %v1476_v42  ;;  %v2023_v10 = vpop.eup %2022 }
 0x5e0   : > { %v1483_v17 = vmul.f32 %v2023_v10, %v2724_v3  ;;  %v1482_v27 = vmul.f32 %v2023_v10, %v2722_v5  ;;  %v625_v3 = vpop.permute.xlu1 %624 }
 0x5e1   : > { %v1386_v55 = vpop.xlane.xlu0 %1385  ;;  %1548 = vmatprep.subr.bf16.mxu0 %v1517_v9  ;;  %v711_v5 = vadd.f32 %v2779_v18, %v625_v3  ;;  %v713_v15 = vadd.f32 %v2781_v8, %v625_v3 }
 0x5e2   : > { %2028 = vrcp.f32 %v1386_v55  ;;  %1549 = vmatpush1.bf16.xpose.msra.mxu0 %v1516_v1 }
 0x5e4   : > { %v2025_v37 = vpop.eup %2024 }
 0x5e5   : > { %v1481_v60 = vmul.f32 %v2025_v37, %v2736_v25  ;;  %v1480_v28 = vmul.f32 %v2025_v37, %v2734_v20 }
 0x5e7   : > { %v1519_v30 = vpack.c.bf16 %v1483_v17, %v1481_v60  ;;  %v1518_v56 = vpack.c.bf16 %v1482_v27, %v1480_v28  ;;  %v2027_v50 = vpop.eup %2026 }
 0x5e8   : > { %v1487_v57 = vmul.f32 %v2027_v50, %v2744_v32  ;;  %v1486_v25 = vmul.f32 %v2027_v50, %v2742_v53 }
 0x5e9   : > { %1550 = vmatprep.subr.bf16.mxu0 %v1519_v30  ;;  %v1392_v2 = vpop.xlane.xlu0 %1391 }
 0x5ea   : > { %1551 = vmatpush1.bf16.xpose.msra.mxu0 %v1518_v56  ;;  %2030 = vrcp.f32 %v1392_v2 }
 0x5ec   : > { %v2029_v12 = vpop.eup %2028 }
 0x5ed   : > { %v1485_v16 = vmul.f32 %v2029_v12, %v2754_v58  ;;  %v1484_v6 = vmul.f32 %v2029_v12, %v2752_v24 }
 0x5ef   : > { %v1521_v34 = vpack.c.bf16 %v1487_v57, %v1485_v16  ;;  %v1520_v20 = vpack.c.bf16 %v1486_v25, %v1484_v6 }
 0x5f1   : > { %v620_v0 = vpop.permute.xlu0 %619  ;;  %1552 = vmatprep.subr.bf16.mxu0 %v1521_v34 }
 0x5f2   : > { %v707_v62 = vadd.f32 %v2775_v13, %v620_v0  ;;  %v709_v48 = vadd.f32 %v2777_v31, %v620_v0  ;;  %1553 = vmatpush1.bf16.xpose.msra.mxu0 %v1520_v20 }
 0x5f4   : > { %v729_v58 = vpack.c.bf16 %v711_v5, %v707_v62  ;;  %v730_v32 = vpack.c.bf16 %v713_v15, %v709_v48  ;;  %v2031_v31 = vpop.eup %2030 }
 0x5f5   : > { %v635_v53 = vpop.permute.xlu0 %634  ;;  %v1489_v33 = vmul.f32 %v2031_v31, %v2764_v40  ;;  %v1488_v46 = vmul.f32 %v2031_v31, %v2762_v14 }
 0x5f6   : > { %1556 = vmatprep.mubr.bf16.mxu0 %v730_v32  ;;  %v721_v63 = vadd.f32 %v2809_v47, %v635_v53  ;;  %v723_v7 = vadd.f32 %v2814_v54, %v635_v53 }
 0x5f9   : > { %v1593_v38 = vpop.permute.xlu0 %1592 }
 0x611   : > { %v1395_v24 = vpop.xlane.xlu1 %1394 }
 0x612   : > { %2032 = vrcp.f32 %v1395_v24 }
 0x615   : > { %v630_v61 = vpop.permute.xlu1 %629 }
 0x616   : > { %v717_v18 = vadd.f32 %v2804_v29, %v630_v61  ;;  %v719_v8 = vadd.f32 %v2807_v35, %v630_v61 }
 0x618   : > { %v731_v13 = vpack.c.bf16 %v721_v63, %v717_v18  ;;  %v732_v45 = vpack.c.bf16 %v723_v7, %v719_v8 }
 0x619   : > { %v1588_v11 = vpop.permute.xlu1 %1587 }
 0x61c   : > { %v2033_v44 = vpop.eup %2032 }
 0x61d   : > { %v1491_v22 = vmul.f32 %v2033_v44, %v2822_v41  ;;  %v1490_v52 = vmul.f32 %v2033_v44, %v2820_v26 }
 0x61f   : > { %v1523_v51 = vpack.c.bf16 %v1491_v22, %v1489_v33  ;;  %v1522_v47 = vpack.c.bf16 %v1490_v52, %v1488_v46 }
 0x621   : > { %1554 = vmatprep.subr.bf16.mxu0 %v1523_v51 }
 0x622   : > { %1555 = vmatpush1.bf16.xpose.msra.mxu0 %v1522_v47 }
 0x629   : > { %1557 = vmatmul.mubr.bf16.vlgmr.msra.gmra.mrb[20].mxu0 %v729_v58 }
 0x62a   : > { %1566 = vmatprep.mubr.bf16.mxu0 %v732_v45 }
 0x631   : > { %1567 = vmatmul.mubr.bf16.gmra.mrb[24].mxu0 %v731_v13 }
 0x6fc   : > { %v1558_v29 = vpop.f32.mrb[20].mxu0 }
 0x6fd   : > { %v1560_v35 = vpop.f32.mrb[21].mxu0 }
 0x6fe   : > { %v1562_v54 = vpop.f32.mrb[22].mxu0 }
 0x6ff   : > { %v1579_v19 = vpack.c.bf16 %v1562_v54, %v1558_v29  ;;  %v1564_v59 = vpop.f32.mrb[23].mxu0 }
 0x700   : > { %v1580_v40 = vpack.c.bf16 %v1564_v59, %v1560_v35 }
 0x702   : > { %1603 = vmatprep.subr.bf16.mxu1 %v1580_v40 }
 0x703   : > { %1604 = vmatpush1.bf16.msra.mxu1 %v1579_v19 }
 0x704   : > { %v1568_v41 = vpop.f32.mrb[24].mxu0 }
 0x705   : > { %v1570_v14 = vpop.f32.mrb[25].mxu0 }
 0x706   : > { %v1572_v49 = vpop.f32.mrb[26].mxu0 }
 0x707   : > { %v1581_v26 = vpack.c.bf16 %v1572_v49, %v1568_v41  ;;  %v1574_v39 = vpop.f32.mrb[27].mxu0 }
 0x708   : > { %v1582_v43 = vpack.c.bf16 %v1574_v39, %v1570_v14 }
 0x70a   : > { %1605 = vmatprep.subr.bf16.mxu1 %v1582_v43 }
 0x70b   : > { %1606 = vmatpush1.bf16.msra.mxu1 %v1581_v26 }
 0x70e   : > { %1778 = vmatmul.mubr.msk.bf16.vlgmr.msra.gmra.mrb[72].mxu1 %vm652_vm5, %v1841_v4 }
 0x7e1   : > { %v1637_v23 = vpop.f32.mrb[72].mxu1 }
 0x7e2   : > { %v1638_v21 = vadd.f32 %v1637_v23, %v1588_v11  ;;  %v1639_v42 = vpop.f32.mrb[73].mxu1 }
 0x7e3   : > { %v1640_v36 = vadd.f32 %v1639_v42, %v1588_v11  ;;  %v1641_v9 = vpop.f32.mrb[74].mxu1 }
 0x7e4   : > { %v1646_v1 = vmax.f32 %v1638_v21, 0.0  ;;  %v1642_v55 = vadd.f32 %v1641_v9, %v1593_v38  ;;  %v1643_v10 = vpop.f32.mrb[75].mxu1 }
 0x7e5   : > { %v1647_v37 = vmax.f32 %v1640_v36, 0.0  ;;  %v1644_v60 = vadd.f32 %v1643_v10, %v1593_v38 }
 0x7e6   : > { %v1648_v17 = vmax.f32 %v1642_v55, 0.0 }
 0x7e7   : > { %v1787_v28 = vpack.c.bf16 %v1647_v37, %v1646_v1  ;;  %v1649_v27 = vmax.f32 %v1644_v60, 0.0 }
 0x7e9   : > { %1662 = vst [vmem:[%s325_s26] sm:$0xff] %v1787_v28  ;;  %v1788_v30 = vpack.c.bf16 %v1649_v27, %v1648_v17 }
 0x7eb   : > { %1663 = vst [vmem:[%s325_s26 + $0x8] sm:$0xff] %v1788_v30 }
 0x7ec   : > { %2047 = shalt.err (!%p2044_p3)
}
 0x7ed   : > { %s2048_s24 = scalar_lea.hbm %s2879_s16, 256  ;;  %s2052_s28 = scalar_lea.hbm %s2931_s9, 512 }
 0x7ee   : > { %p2049_p4 = scmp.ne.s32.totalorder %s2879_s16, %s2048_s24  ;;  %p2053_p9 = scmp.lt.u32.totalorder %s2879_s16, %s2931_s9 }
 0x7ef   : > { %p2054_p10 = scmp.lt.u32.totalorder %s2052_s28, %s2048_s24  ;;  %p2056_p12 = scmp.lt.u32.totalorder %s2048_s24, %s2879_s16 }
 0x7f0   : > { %p2050_p7 = pnand %p2049_p4, %p2191_p5 }
 0x7f1   : > { %p2055_p11 = por %p2054_p10, %p2053_p9 }
 0x7f2   : > { %p2051_p8 = pneg %p2050_p7 }
 0x7f3   : > { %p2057_p13 = por %p2056_p12, %p2055_p11 }
 0x7f5   : > { %p2058_p0 = pnand %p2057_p13, %p2051_p8 }
 0x7f7   : > { %2061 = shalt.err (!%p2058_p0)
}
 0x7f8   : > { %s2101_s21 = smov 128   ;;  %s2102_s13 = smov 8  }
 0x7f9   : > { %1790 = dma.vmem_to_hbm [thread:$0]  (%p2191_p5), %s2874_s27, 256, %s2879_s16, %s2881_s17, %s2101_s21, %s2101_s21, %s2102_s13  }
 0x7fa PF: > { %p1796_p1 = scmp.ge.s32.totalorder %s2096_s12, 2  ;;  %s1693_s22 = sand.u32 1, %s2084_s30  }
 0x7fb   : > { %s1694_s23 = scalar_lea.sflag [#allocation4], %s1693_s22 }
 0x7fc   : > { %p1793_p2 = pnand %p1796_p1, %p2195_p6 }
 0x7fe   : > { %2079 = dma.done.wait (!%p1793_p2), %s1694_s23, 256  }
 0x7ff   : > { %2081 = vsyncadd (!%p1793_p2), %s1694_s23, 4294967040  ;;  %p19_p3 = scmp.ge.s32.totalorder %s2178_s15, 4   ;;  %s3024_s30 = smov %s2088_s10 }
 0x800   : > { %s3025_s10 = smov %s2092_s11  ;;  %s3026_s11 = smov %s2189_s18 }
 0x801   : > { %s3027_s12 = smov %s2178_s15  ;;  %21 = sbr.rel (!%p19_p3) target bundleno = 3 (0x3), region = 91 }
 0x808   :  { %1699 = vsyncpa [#allocation4], 1 }
 0x809   :  { %1701 = vsyncpa [#allocation4 + $0x1], 1 }

</bundles_post_ra>
